<compile_context>
chip_gen: v7x
topology: tpu7x:2x2x1
jax: 0.10.0
libtpu: 0.0.40
codegen_flags: <defaults>
</compile_context>

<pallas_src>
import numpy as np
import jax
import jax.numpy as jnp
from jax.experimental import pallas as pl
from jax.experimental.pallas import tpu as pltpu


def _conv3x3_same(inp, w_ref, b_ref):
    """3x3 'same' convolution of one (H, W, C) f32 tile.

    inp   : (H, W, C) f32 value (unpadded)
    w_ref : (3, 3*C, C) bf16 ref, layout [ky, kx*C + ci, co]
    b_ref : (1, C) f32 ref
    returns (H*W, C) f32 with bias added.
    """
    H, W, C = inp.shape

    # Fold the 3 kx taps into the channel (contraction) axis -> (H, W, 3C).
    zcol = jnp.zeros((H, 1, C), inp.dtype)
    left = jnp.concatenate([zcol, inp[:, :W - 1, :]], axis=1)   # value at x-1
    right = jnp.concatenate([inp[:, 1:, :], zcol], axis=1)      # value at x+1
    x3 = jnp.concatenate([left, inp, right], axis=2)            # (H, W, 3C)

    # ky taps: zero-pad the row axis once, then take 3 row-shifted views.
    zrow = jnp.zeros((1, W, 3 * C), inp.dtype)
    x3p = jnp.concatenate([zrow, x3, zrow], axis=0)             # (H+2, W, 3C) f32

    acc = jnp.zeros((H * W, C), jnp.float32)
    for ky in range(3):                                         # 3 K=192 MXU matmuls
        patch = x3p[ky:ky + H].reshape(H * W, 3 * C).astype(jnp.bfloat16)
        acc = acc + jnp.dot(patch, w_ref[ky],
                            preferred_element_type=jnp.float32)
    return acc + b_ref[...]                                     # (1, C) broadcast, f32


def _resblock_kernel(x_ref, w1_ref, b1_ref, w2_ref, b2_ref, out_ref):
    # x_ref/out_ref: (1, H, W, C) f32 blocks (one batch element per grid step).
    H = out_ref.shape[1]
    W = out_ref.shape[2]
    C = out_ref.shape[3]

    x = x_ref[0]                                     # (H, W, C) f32, aligned block

    h = _conv3x3_same(x, w1_ref, b1_ref)             # conv1 + bias (f32 acc)
    h = jnp.maximum(h, 0.0).reshape(H, W, C)         # ReLU in f32

    y = _conv3x3_same(h, w2_ref, b2_ref)             # conv2 + bias (f32 acc)
    y = y.reshape(H, W, C)

    out_ref[0] = (y + x).astype(out_ref.dtype)       # residual add in f32


def residual_block(x_nchw, w1, b1, w2, b2):
    """x_nchw: (N, C, H, W) f32; w*: (Cout, Cin, 3, 3) OIHW; b*: (C,). -> (N, C, H, W)."""
    N, C, H, W = x_nchw.shape
    x = jnp.transpose(x_nchw, (0, 2, 3, 1)).astype(jnp.float32)       # NHWC f32

    def pack_w(w):
        # (Cout, Cin, ky, kx) -> (ky, kx, Cin, Cout) -> (3, 3*Cin, Cout), bf16 for MXU.
        wt = jnp.transpose(w, (2, 3, 1, 0))
        return wt.reshape(3, 3 * C, C).astype(jnp.bfloat16)

    w1p = pack_w(w1)
    w2p = pack_w(w2)
    b1r = b1.reshape(1, C).astype(jnp.float32)
    b2r = b2.reshape(1, C).astype(jnp.float32)

    out_nhwc = pl.pallas_call(
        _resblock_kernel,
        out_shape=jax.ShapeDtypeStruct((N, H, W, C), jnp.float32),
        grid_spec=pltpu.PrefetchScalarGridSpec(
            num_scalar_prefetch=0,
            grid=(N,),
            in_specs=[
                pl.BlockSpec((1, H, W, C), lambda n: (n, 0, 0, 0)),   # x (unpadded)
                pl.BlockSpec((3, 3 * C, C), lambda n: (0, 0, 0)),     # w1 packed
                pl.BlockSpec((1, C), lambda n: (0, 0)),               # b1
                pl.BlockSpec((3, 3 * C, C), lambda n: (0, 0, 0)),     # w2 packed
                pl.BlockSpec((1, C), lambda n: (0, 0)),               # b2
            ],
            out_specs=pl.BlockSpec((1, H, W, C), lambda n: (n, 0, 0, 0)),
        ),
        compiler_params=pltpu.CompilerParams(
            dimension_semantics=("parallel",)),                       # 2 TCs on v7x
    )(x, w1p, b1r, w2p, b2r)

    return jnp.transpose(out_nhwc, (0, 3, 1, 2))                      # back to NCHW


def _reference(x_nchw, w1, b1, w2, b2):
    """Plain-JAX reference mirroring Conv2d(nf,nf,3,1,1) -> ReLU -> Conv2d + x."""
    def conv(x, w, b):
        y = jax.lax.conv_general_dilated(
            x, w, window_strides=(1, 1), padding=((1, 1), (1, 1)),
            dimension_numbers=('NCHW', 'OIHW', 'NCHW'),
            precision=jax.lax.Precision.HIGHEST)
        return y + b.reshape(1, -1, 1, 1)
    h = jax.nn.relu(conv(x_nchw, w1, b1))
    return conv(h, w2, b2) + x_nchw


if __name__ == "__main__":
    key = jax.random.PRNGKey(0)
    N, C, H, W = 2, 64, 16, 16   # nf=64 (module default), small spatial size
    k1, k2, k3, k4, k5 = jax.random.split(key, 5)

    x = jax.random.normal(k1, (N, C, H, W), dtype=jnp.float32)
    scale = 0.05
    w1 = jax.random.normal(k2, (C, C, 3, 3), dtype=jnp.float32) * scale
    b1 = jax.random.normal(k3, (C,), dtype=jnp.float32) * scale
    w2 = jax.random.normal(k4, (C, C, 3, 3), dtype=jnp.float32) * scale
    b2 = jax.random.normal(k5, (C,), dtype=jnp.float32) * scale

    out = jax.block_until_ready(residual_block(x, w1, b1, w2, b2))
    ref = _reference(x, w1, b1, w2, b2)

    assert out.shape == ref.shape == (N, C, H, W)
    # Loose-ish tolerance: matmul inputs are bf16 on the MXU (accumulation in f32).
    np.testing.assert_allclose(np.asarray(out), np.asarray(ref), rtol=5e-2, atol=5e-2)

    print("KERNEL_OK")
</pallas_src>

<mosaic_0001>
module attributes {stable_mosaic.version = 11 : i64} {
  func.func @_resblock_kernel(%arg0: i32, %arg1: memref<1x16x16x64xf32, #tpu.memory_space<vmem>>, %arg2: memref<3x192x64xbf16, #tpu.memory_space<vmem>>, %arg3: memref<1x64xf32, #tpu.memory_space<vmem>>, %arg4: memref<3x192x64xbf16, #tpu.memory_space<vmem>>, %arg5: memref<1x64xf32, #tpu.memory_space<vmem>>, %arg6: memref<1x16x16x64xf32, #tpu.memory_space<vmem>>) attributes {dimension_semantics = [#tpu.dimension_semantics<parallel>], iteration_bounds = array<i64: 2>, scalar_prefetch = 0 : i64, scratch_operands = 0 : i64, tpu.core_type = #tpu.core_type<tc>, window_params = [{transform_indices = @transform_0, window_bounds = array<i64: 1, 16, 16, 64>}, {pipeline_mode = #tpu.pipeline_mode<synchronous>, transform_indices = @transform_1, window_bounds = array<i64: 3, 192, 64>}, {pipeline_mode = #tpu.pipeline_mode<synchronous>, transform_indices = @transform_2, window_bounds = array<i64: 1, 64>}, {pipeline_mode = #tpu.pipeline_mode<synchronous>, transform_indices = @transform_3, window_bounds = array<i64: 3, 192, 64>}, {pipeline_mode = #tpu.pipeline_mode<synchronous>, transform_indices = @transform_4, window_bounds = array<i64: 1, 64>}, {transform_indices = @transform_5, window_bounds = array<i64: 1, 16, 16, 64>}]} {
    %c0 = arith.constant 0 : index
    %c0_0 = arith.constant 0 : index
    %c0_1 = arith.constant 0 : index
    %c0_2 = arith.constant 0 : index
    %0 = vector.load %arg1[%c0, %c0_0, %c0_1, %c0_2] : memref<1x16x16x64xf32, #tpu.memory_space<vmem>>, vector<1x16x16x64xf32>
    %1 = vector.shape_cast %0 : vector<1x16x16x64xf32> to vector<16x16x64xf32>
    %cst = arith.constant 0.000000e+00 : f32
    %2 = vector.broadcast %cst : f32 to vector<16x1x64xf32>
    %3 = vector.extract_strided_slice %1 {offsets = [0, 0, 0], sizes = [16, 15, 64], strides = [1, 1, 1]} : vector<16x16x64xf32> to vector<16x15x64xf32>
    %4 = tpu.concatenate %2, %3 in 1 : vector<16x1x64xf32>, vector<16x15x64xf32> -> vector<16x16x64xf32>
    %5 = vector.extract_strided_slice %1 {offsets = [0, 1, 0], sizes = [16, 15, 64], strides = [1, 1, 1]} : vector<16x16x64xf32> to vector<16x15x64xf32>
    %6 = tpu.concatenate %5, %2 in 1 : vector<16x15x64xf32>, vector<16x1x64xf32> -> vector<16x16x64xf32>
    %7 = tpu.concatenate %4, %1, %6 in 2 : vector<16x16x64xf32>, vector<16x16x64xf32>, vector<16x16x64xf32> -> vector<16x16x192xf32>
    %cst_3 = arith.constant 0.000000e+00 : f32
    %8 = vector.broadcast %cst_3 : f32 to vector<1x16x192xf32>
    %9 = tpu.concatenate %8, %7, %8 in 0 : vector<1x16x192xf32>, vector<16x16x192xf32>, vector<1x16x192xf32> -> vector<18x16x192xf32>
    %cst_4 = arith.constant 0.000000e+00 : f32
    %10 = vector.broadcast %cst_4 : f32 to vector<256x64xf32>
    %11 = vector.extract_strided_slice %9 {offsets = [0, 0, 0], sizes = [16, 16, 192], strides = [1, 1, 1]} : vector<18x16x192xf32> to vector<16x16x192xf32>
    %12 = vector.shape_cast %11 : vector<16x16x192xf32> to vector<256x192xf32>
    %13 = arith.truncf %12 : vector<256x192xf32> to vector<256x192xbf16>
    %c0_5 = arith.constant 0 : index
    %c0_6 = arith.constant 0 : index
    %c0_7 = arith.constant 0 : index
    %14 = vector.load %arg2[%c0_5, %c0_6, %c0_7] : memref<3x192x64xbf16, #tpu.memory_space<vmem>>, vector<1x192x64xbf16>
    %15 = vector.shape_cast %14 : vector<1x192x64xbf16> to vector<192x64xbf16>
    %cst_8 = arith.constant dense<0.000000e+00> : vector<256x64xf32>
    %16 = tpu.matmul %13, %15, %cst_8 {dimension_numbers = #tpu.dot_dimension_numbers<[1], [0], [0], [1], [0, 0, 1, 1], [], []>} : vector<256x192xbf16>, vector<192x64xbf16>, vector<256x64xf32> -> vector<256x64xf32>
    %17 = arith.addf %10, %16 : vector<256x64xf32>
    %18 = vector.extract_strided_slice %9 {offsets = [1, 0, 0], sizes = [16, 16, 192], strides = [1, 1, 1]} : vector<18x16x192xf32> to vector<16x16x192xf32>
    %19 = vector.shape_cast %18 : vector<16x16x192xf32> to vector<256x192xf32>
    %20 = arith.truncf %19 : vector<256x192xf32> to vector<256x192xbf16>
    %c1 = arith.constant 1 : index
    %c0_9 = arith.constant 0 : index
    %c0_10 = arith.constant 0 : index
    %21 = vector.load %arg2[%c1, %c0_9, %c0_10] : memref<3x192x64xbf16, #tpu.memory_space<vmem>>, vector<1x192x64xbf16>
    %22 = vector.shape_cast %21 : vector<1x192x64xbf16> to vector<192x64xbf16>
    %cst_11 = arith.constant dense<0.000000e+00> : vector<256x64xf32>
    %23 = tpu.matmul %20, %22, %cst_11 {dimension_numbers = #tpu.dot_dimension_numbers<[1], [0], [0], [1], [0, 0, 1, 1], [], []>} : vector<256x192xbf16>, vector<192x64xbf16>, vector<256x64xf32> -> vector<256x64xf32>
    %24 = arith.addf %17, %23 : vector<256x64xf32>
    %25 = vector.extract_strided_slice %9 {offsets = [2, 0, 0], sizes = [16, 16, 192], strides = [1, 1, 1]} : vector<18x16x192xf32> to vector<16x16x192xf32>
    %26 = vector.shape_cast %25 : vector<16x16x192xf32> to vector<256x192xf32>
    %27 = arith.truncf %26 : vector<256x192xf32> to vector<256x192xbf16>
    %c2 = arith.constant 2 : index
    %c0_12 = arith.constant 0 : index
    %c0_13 = arith.constant 0 : index
    %28 = vector.load %arg2[%c2, %c0_12, %c0_13] : memref<3x192x64xbf16, #tpu.memory_space<vmem>>, vector<1x192x64xbf16>
    %29 = vector.shape_cast %28 : vector<1x192x64xbf16> to vector<192x64xbf16>
    %cst_14 = arith.constant dense<0.000000e+00> : vector<256x64xf32>
    %30 = tpu.matmul %27, %29, %cst_14 {dimension_numbers = #tpu.dot_dimension_numbers<[1], [0], [0], [1], [0, 0, 1, 1], [], []>} : vector<256x192xbf16>, vector<192x64xbf16>, vector<256x64xf32> -> vector<256x64xf32>
    %31 = arith.addf %24, %30 : vector<256x64xf32>
    %c0_15 = arith.constant 0 : index
    %c0_16 = arith.constant 0 : index
    %32 = vector.load %arg3[%c0_15, %c0_16] : memref<1x64xf32, #tpu.memory_space<vmem>>, vector<1x64xf32>
    %33 = vector.broadcast %32 : vector<1x64xf32> to vector<256x64xf32>
    %34 = arith.addf %31, %33 : vector<256x64xf32>
    %cst_17 = arith.constant 0.000000e+00 : f32
    %35 = vector.broadcast %cst_17 : f32 to vector<256x64xf32>
    %36 = arith.maximumf %34, %35 : vector<256x64xf32>
    %37 = vector.shape_cast %36 : vector<256x64xf32> to vector<16x16x64xf32>
    %cst_18 = arith.constant 0.000000e+00 : f32
    %38 = vector.broadcast %cst_18 : f32 to vector<16x1x64xf32>
    %39 = vector.extract_strided_slice %37 {offsets = [0, 0, 0], sizes = [16, 15, 64], strides = [1, 1, 1]} : vector<16x16x64xf32> to vector<16x15x64xf32>
    %40 = tpu.concatenate %38, %39 in 1 : vector<16x1x64xf32>, vector<16x15x64xf32> -> vector<16x16x64xf32>
    %41 = vector.extract_strided_slice %37 {offsets = [0, 1, 0], sizes = [16, 15, 64], strides = [1, 1, 1]} : vector<16x16x64xf32> to vector<16x15x64xf32>
    %42 = tpu.concatenate %41, %38 in 1 : vector<16x15x64xf32>, vector<16x1x64xf32> -> vector<16x16x64xf32>
    %43 = tpu.concatenate %40, %37, %42 in 2 : vector<16x16x64xf32>, vector<16x16x64xf32>, vector<16x16x64xf32> -> vector<16x16x192xf32>
    %cst_19 = arith.constant 0.000000e+00 : f32
    %44 = vector.broadcast %cst_19 : f32 to vector<1x16x192xf32>
    %45 = tpu.concatenate %44, %43, %44 in 0 : vector<1x16x192xf32>, vector<16x16x192xf32>, vector<1x16x192xf32> -> vector<18x16x192xf32>
    %cst_20 = arith.constant 0.000000e+00 : f32
    %46 = vector.broadcast %cst_20 : f32 to vector<256x64xf32>
    %47 = vector.extract_strided_slice %45 {offsets = [0, 0, 0], sizes = [16, 16, 192], strides = [1, 1, 1]} : vector<18x16x192xf32> to vector<16x16x192xf32>
    %48 = vector.shape_cast %47 : vector<16x16x192xf32> to vector<256x192xf32>
    %49 = arith.truncf %48 : vector<256x192xf32> to vector<256x192xbf16>
    %c0_21 = arith.constant 0 : index
    %c0_22 = arith.constant 0 : index
    %c0_23 = arith.constant 0 : index
    %50 = vector.load %arg4[%c0_21, %c0_22, %c0_23] : memref<3x192x64xbf16, #tpu.memory_space<vmem>>, vector<1x192x64xbf16>
    %51 = vector.shape_cast %50 : vector<1x192x64xbf16> to vector<192x64xbf16>
    %cst_24 = arith.constant dense<0.000000e+00> : vector<256x64xf32>
    %52 = tpu.matmul %49, %51, %cst_24 {dimension_numbers = #tpu.dot_dimension_numbers<[1], [0], [0], [1], [0, 0, 1, 1], [], []>} : vector<256x192xbf16>, vector<192x64xbf16>, vector<256x64xf32> -> vector<256x64xf32>
    %53 = arith.addf %46, %52 : vector<256x64xf32>
    %54 = vector.extract_strided_slice %45 {offsets = [1, 0, 0], sizes = [16, 16, 192], strides = [1, 1, 1]} : vector<18x16x192xf32> to vector<16x16x192xf32>
    %55 = vector.shape_cast %54 : vector<16x16x192xf32> to vector<256x192xf32>
    %56 = arith.truncf %55 : vector<256x192xf32> to vector<256x192xbf16>
    %c1_25 = arith.constant 1 : index
    %c0_26 = arith.constant 0 : index
    %c0_27 = arith.constant 0 : index
    %57 = vector.load %arg4[%c1_25, %c0_26, %c0_27] : memref<3x192x64xbf16, #tpu.memory_space<vmem>>, vector<1x192x64xbf16>
    %58 = vector.shape_cast %57 : vector<1x192x64xbf16> to vector<192x64xbf16>
    %cst_28 = arith.constant dense<0.000000e+00> : vector<256x64xf32>
    %59 = tpu.matmul %56, %58, %cst_28 {dimension_numbers = #tpu.dot_dimension_numbers<[1], [0], [0], [1], [0, 0, 1, 1], [], []>} : vector<256x192xbf16>, vector<192x64xbf16>, vector<256x64xf32> -> vector<256x64xf32>
    %60 = arith.addf %53, %59 : vector<256x64xf32>
    %61 = vector.extract_strided_slice %45 {offsets = [2, 0, 0], sizes = [16, 16, 192], strides = [1, 1, 1]} : vector<18x16x192xf32> to vector<16x16x192xf32>
    %62 = vector.shape_cast %61 : vector<16x16x192xf32> to vector<256x192xf32>
    %63 = arith.truncf %62 : vector<256x192xf32> to vector<256x192xbf16>
    %c2_29 = arith.constant 2 : index
    %c0_30 = arith.constant 0 : index
    %c0_31 = arith.constant 0 : index
    %64 = vector.load %arg4[%c2_29, %c0_30, %c0_31] : memref<3x192x64xbf16, #tpu.memory_space<vmem>>, vector<1x192x64xbf16>
    %65 = vector.shape_cast %64 : vector<1x192x64xbf16> to vector<192x64xbf16>
    %cst_32 = arith.constant dense<0.000000e+00> : vector<256x64xf32>
    %66 = tpu.matmul %63, %65, %cst_32 {dimension_numbers = #tpu.dot_dimension_numbers<[1], [0], [0], [1], [0, 0, 1, 1], [], []>} : vector<256x192xbf16>, vector<192x64xbf16>, vector<256x64xf32> -> vector<256x64xf32>
    %67 = arith.addf %60, %66 : vector<256x64xf32>
    %c0_33 = arith.constant 0 : index
    %c0_34 = arith.constant 0 : index
    %68 = vector.load %arg5[%c0_33, %c0_34] : memref<1x64xf32, #tpu.memory_space<vmem>>, vector<1x64xf32>
    %69 = vector.broadcast %68 : vector<1x64xf32> to vector<256x64xf32>
    %70 = arith.addf %67, %69 : vector<256x64xf32>
    %71 = vector.shape_cast %70 : vector<256x64xf32> to vector<16x16x64xf32>
    %72 = arith.addf %71, %1 : vector<16x16x64xf32>
    %c0_35 = arith.constant 0 : index
    %c0_36 = arith.constant 0 : index
    %c0_37 = arith.constant 0 : index
    %c0_38 = arith.constant 0 : index
    %73 = vector.load %arg6[%c0_35, %c0_36, %c0_37, %c0_38] : memref<1x16x16x64xf32, #tpu.memory_space<vmem>>, vector<1x16x16x64xf32>
    %74 = vector.shape_cast %73 : vector<1x16x16x64xf32> to vector<16x16x64xf32>
    %75 = vector.shape_cast %72 : vector<16x16x64xf32> to vector<1x16x16x64xf32>
    tpu.vector_store %arg6[%c0_35, %c0_36, %c0_37, %c0_38], %75 {strides = array<i32>} : memref<1x16x16x64xf32, #tpu.memory_space<vmem>>, vector<1x16x16x64xf32>,
    return
  }
  func.func @transform_0(%arg0: i32) -> (i32, i32, i32, i32) {
    %c0_i32 = arith.constant 0 : i32
    %c0_i32_0 = arith.constant 0 : i32
    %c0_i32_1 = arith.constant 0 : i32
    %c0_i32_2 = arith.constant 0 : i32
    return %arg0, %c0_i32, %c0_i32_0, %c0_i32_1 : i32, i32, i32, i32
  }
  func.func @transform_1(%arg0: i32) -> (i32, i32, i32) {
    %c0_i32 = arith.constant 0 : i32
    %c0_i32_0 = arith.constant 0 : i32
    %c0_i32_1 = arith.constant 0 : i32
    %c0_i32_2 = arith.constant 0 : i32
    return %c0_i32, %c0_i32_0, %c0_i32_1 : i32, i32, i32
  }
  func.func @transform_2(%arg0: i32) -> (i32, i32) {
    %c0_i32 = arith.constant 0 : i32
    %c0_i32_0 = arith.constant 0 : i32
    %c0_i32_1 = arith.constant 0 : i32
    return %c0_i32, %c0_i32_0 : i32, i32
  }
  func.func @transform_3(%arg0: i32) -> (i32, i32, i32) {
    %c0_i32 = arith.constant 0 : i32
    %c0_i32_0 = arith.constant 0 : i32
    %c0_i32_1 = arith.constant 0 : i32
    %c0_i32_2 = arith.constant 0 : i32
    return %c0_i32, %c0_i32_0, %c0_i32_1 : i32, i32, i32
  }
  func.func @transform_4(%arg0: i32) -> (i32, i32) {
    %c0_i32 = arith.constant 0 : i32
    %c0_i32_0 = arith.constant 0 : i32
    %c0_i32_1 = arith.constant 0 : i32
    return %c0_i32, %c0_i32_0 : i32, i32
  }
  func.func @transform_5(%arg0: i32) -> (i32, i32, i32, i32) {
    %c0_i32 = arith.constant 0 : i32
    %c0_i32_0 = arith.constant 0 : i32
    %c0_i32_1 = arith.constant 0 : i32
    %c0_i32_2 = arith.constant 0 : i32
    return %arg0, %c0_i32, %c0_i32_0, %c0_i32_1 : i32, i32, i32, i32
  }
}

</mosaic_0001>

<bundles_post_ra>
// kernel: tpu_custom_call.1
= control target key start
LH: loop header
LB: loop body
LE: loop exit
PB: predicated region body
PF: predicated region fallthrough
CT: control target
= control target key end

     0   :  { %10 = vsyncpa [#allocation3], 0  ;;  %s5447_s0 = inlined_call_operand.vmem [shape: f32[2,16,16,64], index: 0, kind: input, shape index: {}]   ;;  %s5448_s1 = inlined_call_operand.vmem [shape: bf16[3,192,64], index: 1, kind: input, shape index: {}]   ;;  %s5449_s2 = inlined_call_operand.vmem [shape: f32[1,64], index: 2, kind: input, shape index: {}]   ;;  %s5450_s3 = inlined_call_operand.vmem [shape: bf16[3,192,64], index: 3, kind: input, shape index: {}]   ;;  %s5451_s4 = inlined_call_operand.vmem [shape: f32[1,64], index: 4, kind: input, shape index: {}]   ;;  %s5452_s5 = inlined_call_operand.hbm [shape: f32[2,16,16,64], index: 5, kind: output, shape index: {}]  }
   0x1   :  { %12 = vsyncpa [#allocation3 + $0x1], 0  ;;  %s3671_s18 = smov 0   ;;  %s3673_s19 = smov 0  }
   0x2   :  { %s3675_s20 = smov 0   ;;  %s3677_s21 = smov 0  }
   0x3 LB: > { %s3692_s22 = sadd.s32 4294967295, %s3633_s21   ;;  %s2987_s23 = sadd.s32 4294967294, %s3633_s21   ;;  %s3633_s21 = sphi %s3677_s21, %s5485_s21   ;;  %s3629_s20 = sphi %s3675_s20, %s5484_s20   ;;  %s3625_s19 = sphi %s3673_s19, %s5483_s19   ;;  %s3621_s18 = sphi %s3671_s18, %s5482_s18  }
   0x4   : > { %s3696_s24 = sadd.s32 1, %s3633_s21   ;;  %s135_s25 = sadd.s32 1, %s3629_s20 }
   0x5   : > { %s132_s26 = ssub.s32 %s3633_s21, %s3696_s24  ;;  %p145_p0 = scmp.ne.s32.totalorder %s3629_s20, %s3625_s19 }
   0x6   : > { %p133_p1 = scmp.eq.s32.totalorder %s132_s26, 0  ;;  %p146_p2 = scmp.eq.s32.totalorder %s3692_s22, 1 }
   0x7   : > { %p151_p3 = scmp.ne.s32.totalorder %s3625_s19, %s3621_s18  ;;  %p152_p4 = scmp.eq.s32.totalorder %s2987_s23, 1 }
   0x8   : > { %s3707_s27 = scalar_select %p133_p1, %s3629_s20, %s135_s25  }
   0x9   : > { %p3709_p5 = por %p146_p2, %p145_p0  ;;  %p3713_p6 = por %p152_p4, %p151_p3 }
   0xa   : > { %p2990_p7 = scmp.ge.s32.totalorder %s3633_s21, 1  ;;  %p190_p8 = scmp.lt.s32.totalorder %s3633_s21, 3 }
   0xc   : > { %p191_p9 = pnand %p2990_p7, %p190_p8 }
   0xd   : > { %p218_p10 = scmp.lt.s32.totalorder (!%p191_p9), %s3692_s22, 1  ;;  %v3467_v0 = vld [vmem:[%s5448_s1] sm:$0xff] (!%p191_p9)   ;;  %v3635_v1 = vmov (!%p191_p9), 0   ;;  %v3468_v2 = vld [vmem:[%s5448_s1 + $0x8] sm:$0xff] (!%p191_p9)   ;;  %v3470_v4 = vld [vmem:[%s5448_s1 + $0x10] sm:$0xff] (!%p191_p9)   ;;  %v5453_v5 = vmov (!%p191_p9), 0.0|0.0  }
   0xe   : > { %194 = sbr.rel (%p191_p9) target bundleno = 1102 (0x44e), region = 40  ;;  %1049 = vmatprep.subr.bf16.mxu1 (!%p191_p9), %v3635_v1  ;;  %813 = vmatprep.subr.bf16.mxu0 (!%p191_p9), %v3635_v1  ;;  %v3469_v3 = vld [vmem:[%s5448_s1 + $0x60] sm:$0xff] (!%p191_p9)   ;;  %v3471_v6 = vld [vmem:[%s5448_s1 + $0x68] sm:$0xff] (!%p191_p9)   ;;  %s3637_s26 = smov (!%p191_p9), 64   ;;  %vm385_vm0 = vcmask (!%p191_p9), 1046528   ;;  %v3472_v27 = vld [vmem:[%s5448_s1 + $0x18] sm:$0xff] (!%p191_p9)  }
   0xf   : > { %1050 = vmatpush1.bf16.msra.mxu1 (!%p191_p9), %v3467_v0  ;;  %1081 = vmatprep.mubr.bf16.mxu1 (!%p191_p9), %v5453_v5  ;;  %v3473_v30 = vld [vmem:[%s5448_s1 + $0x70] sm:$0xff] (!%p191_p9)   ;;  %v3474_v35 = vld [vmem:[%s5448_s1 + $0x20] sm:$0xff] (!%p191_p9)   ;;  %v3475_v39 = vld [vmem:[%s5448_s1 + $0x78] sm:$0xff] (!%p191_p9)   ;;  %vm578_vm1 = vcmask (!%p191_p9), 523264   ;;  %vm288_vm2 = vcmask (!%p191_p9), 1040384   ;;  %s215_s13 = sand.u32 (!%p191_p9), 1, %s3625_s19  }
  0x10   : > { %1051 = vmatprep.subr.bf16.mxu1 (!%p191_p9), %v3635_v1  ;;  %814 = vmatpush1.bf16.msra.mxu0 (!%p191_p9), %v3469_v3  ;;  %v3476_v44 = vld [vmem:[%s5448_s1 + $0x28] sm:$0xff] (!%p191_p9)   ;;  %v3477_v45 = vld [vmem:[%s5448_s1 + $0x80] sm:$0xff] (!%p191_p9)   ;;  %v3478_v50 = vld [vmem:[%s5448_s1 + $0x30] sm:$0xff] (!%p191_p9)   ;;  %s2991_s16 = sshll.u32 (!%p191_p9), %s215_s13, 8  ;;  %s3262_s25 = sshll.u32 (!%p191_p9), %s3692_s22, 12 }
  0x11   : > { %815 = vmatprep.subr.bf16.mxu0 (!%p191_p9), %v3635_v1  ;;  %v3479_v53 = vld [vmem:[%s5448_s1 + $0x88] sm:$0xff] (!%p191_p9)   ;;  %v3480_v54 = vld [vmem:[%s5448_s1 + $0x38] sm:$0xff] (!%p191_p9)   ;;  %v3481_v59 = vld [vmem:[%s5448_s1 + $0x90] sm:$0xff] (!%p191_p9)   ;;  %s5238_s23 = scalar_lea.vmem (!%p191_p9), [#allocation2], %s2991_s16  ;;  %s5395_s8 = scalar_lea.hbm (!%p191_p9), %s5452_s5, %s3262_s25 }
  0x12   : > { %v3482_v63 = vld [vmem:[%s5448_s1 + $0x40] sm:$0xff] (!%p191_p9)   ;;  %s2925_s30 = sshll.u32 (!%p191_p9), %s5238_s23, 4  ;;  %s3638_s9 = smov (!%p191_p9), [#allocation2]   ;;  %s5397_s30 = int_to_ptr.vmem [resolvable:$true] %s2925_s30 }
  0x13   : > { %1052 = vmatpush1.bf16.msra.mxu1 (!%p191_p9), %v3468_v2  ;;  %v3483_v2 = vld [vmem:[%s5448_s1 + $0x98] sm:$0xff] (!%p191_p9)   ;;  %s3575_s10 = sshll.u32 (!%p191_p9), %s3638_s9, 4  ;;  %s3576_s10 = int_to_ptr.vmem [resolvable:$false] %s3575_s10 }
  0x14   : > { %1053 = vmatprep.subr.bf16.mxu1 (!%p191_p9), %v3635_v1  ;;  %816 = vmatpush1.bf16.msra.mxu0 (!%p191_p9), %v3471_v6  ;;  %v3484_v6 = vld [vmem:[%s5448_s1 + $0x48] sm:$0xff] (!%p191_p9)   ;;  %s3577_s11 = scalar_lea.vmem (!%p191_p9), %s3576_s10, 8192  ;;  %p3578_p0 = scmp.lt.s32.totalorder (!%p191_p9), %s5397_s30, %s3576_s10 }
  0x15   : > { %s219_s7 = scalar_select %p218_p10, %s3692_s22, 1  ;;  %817 = vmatprep.subr.bf16.mxu0 %v3635_v1 }
  0x16   : > { %s5406_s22 = scalar_lea.sflag [#allocation3], %s215_s13 }
  0x17   : > { %s3261_s12 = sshll.u32 %s219_s7, 8  ;;  %1054 = vmatpush1.bf16.msra.mxu1 %v3470_v4 }
  0x18   : > { %s3740_s17 = scalar_lea.vmem %s5447_s0, %s3261_s12  ;;  %1055 = vmatprep.subr.bf16.mxu1 %v3635_v1  ;;  %818 = vmatpush1.bf16.msra.mxu0 %v3473_v30  ;;  %v3490_v30 = vld [vmem:[%s5448_s1 + $0xb8] sm:$0xff]  }
  0x19   : > { %v3746_v7 = vld [vmem:[%s3740_s17] sm:$0xff]  ;;  %v3749_v8 = vld [vmem:[%s3740_s17 + $0x8] sm:$0xff]  ;;  %v3752_v9 = vld [vmem:[%s3740_s17 + $0x10] sm:$0xff]  ;;  %819 = vmatprep.subr.bf16.mxu0 %v3635_v1 }
  0x1a   : > { %v3307_v10 = vpack.i.bf16 %v3749_v8, %v3746_v7  ;;  %v3758_v11 = vld [vmem:[%s3740_s17 + $0x18] sm:$0xff]  ;;  %v3761_v12 = vld [vmem:[%s3740_s17 + $0x20] sm:$0xff]  ;;  %v3764_v13 = vld [vmem:[%s3740_s17 + $0x28] sm:$0xff]  ;;  %v386_v17 = vrot.slane %v3746_v7, 1  ;;  %v387_v22 = vrot.slane %v3749_v8, 1 }
  0x1b   : > { %v3317_v14 = vpack.i.bf16 %v3764_v13, %v3761_v12  ;;  %v3770_v15 = vld [vmem:[%s3740_s17 + $0x30] sm:$0xff]  ;;  %v3773_v16 = vld [vmem:[%s3740_s17 + $0x38] sm:$0xff]  ;;  %v3312_v18 = vpack.i.bf16 %v3758_v11, %v3752_v9  ;;  %v3783_v20 = vld [vmem:[%s3740_s17 + $0x40] sm:$0xff]  ;;  %1056 = vmatpush1.bf16.msra.mxu1 %v3472_v27 }
  0x1c   : > { %3308 = vrot.lane.b32.xlu0 %v3307_v10, %s3637_s26  ;;  %v3322_v19 = vpack.i.bf16 %v3773_v16, %v3770_v15  ;;  %v3786_v21 = vld [vmem:[%s3740_s17 + $0x48] sm:$0xff]  ;;  %v3790_v23 = vld [vmem:[%s3740_s17 + $0x50] sm:$0xff]  ;;  %v3793_v24 = vld [vmem:[%s3740_s17 + $0x58] sm:$0xff]  ;;  %v388_v28 = vsel %vm385_vm0, %v386_v17, %v387_v22  ;;  %v466_v34 = vsel %vm385_vm0, %v387_v22, 0.0  ;;  %1057 = vmatprep.subr.bf16.mxu1 %v3635_v1 }
  0x1d   : > { %3318 = vrot.lane.b32.xlu1 %v3317_v14, %s3637_s26  ;;  %v3798_v25 = vld [vmem:[%s3740_s17 + $0x60] sm:$0xff]  ;;  %v3801_v26 = vld [vmem:[%s3740_s17 + $0x68] sm:$0xff]  ;;  %v3327_v29 = vpack.i.bf16 %v3786_v21, %v3783_v20  ;;  %v3332_v31 = vpack.i.bf16 %v3793_v24, %v3790_v23  ;;  %v3817_v32 = vld [vmem:[%s3740_s17 + $0x70] sm:$0xff]  ;;  %v3827_v36 = vpack.c.bf16 %v466_v34, %v388_v28  ;;  %820 = vmatpush1.bf16.msra.mxu0 %v3475_v39  ;;  %v289_v34 = vrot.slane %v3746_v7, 7 }
  0x1e   : > { %v3820_v33 = vld [vmem:[%s3740_s17 + $0x78] sm:$0xff]  ;;  %v3830_v37 = vld [vmem:[%s3740_s17 + $0x80] sm:$0xff]  ;;  %v3833_v38 = vld [vmem:[%s3740_s17 + $0x88] sm:$0xff]  ;;  %v3337_v40 = vpack.i.bf16 %v3801_v26, %v3798_v25  ;;  %821 = vmatprep.subr.bf16.mxu0 %v3635_v1  ;;  %v390_v39 = vrot.slane %v3758_v11, 1 }
  0x1f   : > { %v3843_v41 = vld [vmem:[%s3740_s17 + $0x90] sm:$0xff]  ;;  %3030 = vmatprep.mubr.msk.bf16.mxu0 %vm578_vm1, %v3827_v36  ;;  %v3342_v42 = vpack.i.bf16 %v3820_v33, %v3817_v32  ;;  %v3851_v43 = vld [vmem:[%s3740_s17 + $0x98] sm:$0xff]  ;;  %1058 = vmatpush1.bf16.msra.mxu1 %v3474_v35  ;;  %v3861_v46 = vld [vmem:[%s3740_s17 + $0xa0] sm:$0xff]  ;;  %v3347_v47 = vpack.i.bf16 %v3833_v38, %v3830_v37  ;;  %v389_v35 = vrot.slane %v3752_v9, 1 }
  0x20   : > { %3313 = vrot.lane.b32.xlu0 %v3312_v18, %s3637_s26  ;;  %1059 = vmatprep.subr.bf16.mxu1 %v3635_v1  ;;  %v3868_v48 = vld [vmem:[%s3740_s17 + $0xa8] sm:$0xff]  ;;  %v3352_v49 = vpack.i.bf16 %v3851_v43, %v3843_v41  ;;  %v3878_v51 = vld [vmem:[%s3740_s17 + $0xb0] sm:$0xff]  ;;  %v3881_v52 = vld [vmem:[%s3740_s17 + $0xb8] sm:$0xff] }
  0x21   : > { %3323 = vrot.lane.b32.xlu1 %v3322_v19, %s3637_s26  ;;  %822 = vmatpush1.bf16.msra.mxu0 %v3477_v45  ;;  %v3357_v55 = vpack.i.bf16 %v3868_v48, %v3861_v46  ;;  %v3894_v56 = vld [vmem:[%s3740_s17 + $0xc0] sm:$0xff]  ;;  %v3362_v57 = vpack.i.bf16 %v3881_v52, %v3878_v51  ;;  %v3900_v58 = vld [vmem:[%s3740_s17 + $0xc8] sm:$0xff]  ;;  %v3908_v60 = vld [vmem:[%s3740_s17 + $0xd0] sm:$0xff]  ;;  %v391_v45 = vsel %vm385_vm0, %v389_v35, %v390_v39 }
  0x22   : > { %823 = vmatprep.subr.bf16.mxu0 %v3635_v1  ;;  %v3911_v61 = vld [vmem:[%s3740_s17 + $0xd8] sm:$0xff]  ;;  %v3367_v62 = vpack.i.bf16 %v3900_v58, %v3894_v56  ;;  %v3928_v3 = vld [vmem:[%s3740_s17 + $0xe0] sm:$0xff]  ;;  %v3932_v4 = vld [vmem:[%s3740_s17 + $0xe8] sm:$0xff] }
  0x23   : > { %1060 = vmatpush1.bf16.msra.mxu1 %v3476_v44  ;;  %v3372_v0 = vpack.i.bf16 %v3911_v61, %v3908_v60  ;;  %v3377_v10 = vpack.i.bf16 %v3932_v4, %v3928_v3  ;;  %v3941_v14 = vld [vmem:[%s3740_s17 + $0xf0] sm:$0xff]  ;;  %v3944_v17 = vld [vmem:[%s3740_s17 + $0xf8] sm:$0xff]  ;;  %v3485_v18 = vld [vmem:[%s5448_s1 + $0xa0] sm:$0xff]  }
  0x24   : > { %3328 = vrot.lane.b32.xlu0 %v3327_v29, %s3637_s26  ;;  %1061 = vmatprep.subr.bf16.mxu1 %v3635_v1  ;;  %v3382_v19 = vpack.i.bf16 %v3944_v17, %v3941_v14  ;;  %v3486_v22 = vld [vmem:[%s5448_s1 + $0x50] sm:$0xff]   ;;  %v3487_v27 = vld [vmem:[%s5448_s1 + $0xa8] sm:$0xff]   ;;  %v3488_v28 = vld [vmem:[%s5448_s1 + $0x58] sm:$0xff]  }
  0x25   : > { %3333 = vrot.lane.b32.xlu1 %v3332_v31, %s3637_s26  ;;  %824 = vmatpush1.bf16.msra.mxu0 %v3479_v53  ;;  %v3489_v29 = vld [vmem:[%s5448_s1 + $0xb0] sm:$0xff]   ;;  %v290_v31 = vrot.slane %v3749_v8, 7  ;;  %v293_v8 = vrot.slane %v3758_v11, 7 }
  0x26   : > { %825 = vmatprep.subr.bf16.mxu0 %v3635_v1 }
  0x27   : > { %1062 = vmatpush1.bf16.msra.mxu1 %v3478_v50  ;;  %v393_v50 = vrot.slane %v3764_v13, 1 }
  0x28   : > { %3338 = vrot.lane.b32.xlu0 %v3337_v40, %s3637_s26  ;;  %1063 = vmatprep.subr.bf16.mxu1 %v3635_v1  ;;  %v291_v40 = vsel %vm288_vm2, %v289_v34, %v290_v31 }
  0x29   : > { %3343 = vrot.lane.b32.xlu1 %v3342_v42, %s3637_s26  ;;  %826 = vmatpush1.bf16.msra.mxu0 %v3481_v59  ;;  %v369_v42 = vsel %vm288_vm2, 0.0, %v289_v34  ;;  %v392_v59 = vrot.slane %v3761_v12, 1 }
  0x2a   : > { %827 = vmatprep.subr.bf16.mxu0 %v3635_v1 }
  0x2b   : > { %1064 = vmatpush1.bf16.msra.mxu1 %v3480_v54 }
  0x2c   : > { %3348 = vrot.lane.b32.xlu0 %v3347_v47, %s3637_s26  ;;  %1065 = vmatprep.subr.bf16.mxu1 %v3635_v1  ;;  %v292_v47 = vrot.slane %v3752_v9, 7 }
  0x2d   : > { %3353 = vrot.lane.b32.xlu1 %v3352_v49, %s3637_s26  ;;  %828 = vmatpush1.bf16.msra.mxu0 %v3483_v2 }
  0x2e   : > { %829 = vmatprep.subr.bf16.mxu0 %v3635_v1  ;;  %v294_v11 = vsel %vm288_vm2, %v292_v47, %v293_v8 }
  0x2f   : > { %1066 = vmatpush1.bf16.msra.mxu1 %v3482_v63  ;;  %v370_v63 = vsel %vm288_vm2, 0.0, %v292_v47 }
  0x30   : > { %3358 = vrot.lane.b32.xlu0 %v3357_v55, %s3637_s26  ;;  %1067 = vmatprep.subr.bf16.mxu1 %v3635_v1  ;;  %v3491_v55 = vld [vmem:[%s5448_s1 + $0xc0] sm:$0xff]  }
  0x31   : > { %3363 = vrot.lane.b32.xlu1 %v3362_v57, %s3637_s26  ;;  %830 = vmatpush1.bf16.msra.mxu0 %v3485_v18  ;;  %v3492_v18 = vld [vmem:[%s5448_s1 + $0xc8] sm:$0xff]  }
  0x32   : > { %831 = vmatprep.subr.bf16.mxu0 %v3635_v1 }
  0x33   : > { %1068 = vmatpush1.bf16.msra.mxu1 %v3484_v6 }
  0x34   : > { %3368 = vrot.lane.b32.xlu0 %v3367_v62, %s3637_s26  ;;  %1069 = vmatprep.subr.bf16.mxu1 %v3635_v1 }
  0x35   : > { %3373 = vrot.lane.b32.xlu1 %v3372_v0, %s3637_s26  ;;  %832 = vmatpush1.bf16.msra.mxu0 %v3487_v27  ;;  %v394_v27 = vsel %vm385_vm0, %v392_v59, %v393_v50 }
  0x36   : > { %833 = vmatprep.subr.bf16.mxu0 %v3635_v1 }
  0x37   : > { %1070 = vmatpush1.bf16.msra.mxu1 %v3486_v22 }
  0x38   : > { %3378 = vrot.lane.b32.xlu0 %v3377_v10, %s3637_s26  ;;  %1071 = vmatprep.subr.bf16.mxu1 %v3635_v1 }
  0x39   : > { %3383 = vrot.lane.b32.xlu1 %v3382_v19, %s3637_s26  ;;  %834 = vmatpush1.bf16.msra.mxu0 %v3489_v29  ;;  %v296_v19 = vrot.slane %v3764_v13, 7  ;;  %v295_v29 = vrot.slane %v3761_v12, 7  ;;  %v395_v13 = vrot.slane %v3770_v15, 1  ;;  %v396_v12 = vrot.slane %v3773_v16, 1 }
  0x3a   : > { %835 = vmatprep.subr.bf16.mxu0 %v3635_v1 }
  0x3b   : > { %1072 = vmatpush1.bf16.msra.mxu1 %v3488_v28  ;;  %v468_v28 = vsel %vm385_vm0, %v393_v50, 0.0  ;;  %v397_v47 = vsel %vm385_vm0, %v395_v13, %v396_v12  ;;  %v469_v8 = vsel %vm385_vm0, %v396_v12, 0.0  ;;  %v3494_v50 = vld [vmem:[%s5448_s1 + $0xd8] sm:$0xff]  }
  0x3c   : > { %2124 = vmatprep.subr.bf16.mxu1 %v3635_v1  ;;  %v4017_v35 = vpack.c.bf16 %v468_v28, %v394_v27  ;;  %v4045_v59 = vpack.c.bf16 %v469_v8, %v397_v47  ;;  %v305_v47 = vrot.slane %v3793_v24, 7  ;;  %v3498_v8 = vld [vmem:[%s5448_s1 + $0xf8] sm:$0xff]  }
  0x3d   : > { %836 = vmatpush1.bf16.msra.mxu0 %v3490_v30 }
  0x3e   : > { %1082 = vmatmul.mubr.bf16.vlgmr.msra.gmra.mrb[0].mxu1 %v5453_v5  ;;  %1307 = vmatprep.subr.bf16.mxu0 %v3635_v1 }
  0x3f   : > { %3058 = vmatprep.mubr.msk.bf16.mxu1 %vm578_vm1, %v3827_v36  ;;  %v467_v36 = vsel %vm385_vm0, %v390_v39, 0.0  ;;  %v297_v39 = vsel %vm288_vm2, %v295_v29, %v296_v19  ;;  %v302_v19 = vrot.slane %v3786_v21, 7 }
  0x40   : > { %v3996_v57 = vpack.c.bf16 %v467_v36, %v391_v45 }
  0x8e   : > { %v3309_v44 = vpop.permute.xlu0 %3308 }
  0x8f   : > { %v3311_v49 = vunpack.i.h.bf16 %v3309_v44  ;;  %v3310_v7 = vunpack.i.l.bf16 %v3309_v44  ;;  %v3319_v22 = vpop.permute.xlu1 %3318 }
  0x90   : > { %v3321_v31 = vunpack.i.h.bf16 %v3319_v22  ;;  %v3320_v34 = vunpack.i.l.bf16 %v3319_v22  ;;  %v3496_v22 = vld [vmem:[%s5448_s1 + $0xe8] sm:$0xff]  }
  0x91   : > { %v579_v53 = vsel %vm578_vm1, %v369_v42, %v3310_v7  ;;  %v580_v54 = vsel %vm578_vm1, %v291_v40, %v3311_v49  ;;  %v371_v40 = vsel %vm288_vm2, 0.0, %v295_v29  ;;  %v3493_v42 = vld [vmem:[%s5448_s1 + $0xd0] sm:$0xff]   ;;  %v298_v49 = vrot.slane %v3770_v15, 7 }
  0x92   : > { %v612_v62 = vpack.c.bf16 %v580_v54, %v579_v53  ;;  %v3314_v9 = vpop.permute.xlu0 %3313  ;;  %v583_v44 = vsel %vm578_vm1, %v371_v40, %v3320_v34  ;;  %v584_v45 = vsel %vm578_vm1, %v297_v39, %v3321_v31  ;;  %v299_v7 = vrot.slane %v3773_v16, 7  ;;  %v3497_v39 = vld [vmem:[%s5448_s1 + $0xf0] sm:$0xff]  }
  0x93   : > { %v3316_v0 = vunpack.i.h.bf16 %v3314_v9  ;;  %v3315_v2 = vunpack.i.l.bf16 %v3314_v9  ;;  %v3324_v36 = vpop.permute.xlu1 %3323  ;;  %v4043_v53 = vpack.c.bf16 %v584_v45, %v583_v44  ;;  %v372_v15 = vsel %vm288_vm2, 0.0, %v298_v49 }
  0x94   : > { %846 = vmatmul.mubr.bf16.vlgmr.msra.gmra.mrb[0].mxu0 %v612_v62  ;;  %1090 = vmatmul.mubr.bf16.gmra.mrb[4].mxu1 %v612_v62  ;;  %v3326_v54 = vunpack.i.h.bf16 %v3324_v36  ;;  %v398_v62 = vrot.slane %v3783_v20, 1  ;;  %v300_v9 = vsel %vm288_vm2, %v298_v49, %v299_v7  ;;  %v399_v16 = vrot.slane %v3786_v21, 1 }
  0x95   : > { %1308 = vmatpush1.bf16.msra.mxu0 %v3491_v55  ;;  %3031 = vmatprep.mubr.msk.bf16.mxu0 %vm578_vm1, %v3996_v57  ;;  %v581_v6 = vsel %vm578_vm1, %v370_v63, %v3315_v2  ;;  %v582_v10 = vsel %vm578_vm1, %v294_v11, %v3316_v0  ;;  %v3325_v55 = vunpack.i.l.bf16 %v3324_v36  ;;  %v3495_v11 = vld [vmem:[%s5448_s1 + $0xe0] sm:$0xff]   ;;  %v401_v34 = vrot.slane %v3790_v23, 1 }
  0x96   : > { %3059 = vmatprep.mubr.msk.bf16.mxu1 %vm578_vm1, %v3996_v57  ;;  %1309 = vmatprep.subr.bf16.mxu0 %v3635_v1  ;;  %v4015_v30 = vpack.c.bf16 %v582_v10, %v581_v6  ;;  %v586_v0 = vsel %vm578_vm1, %v300_v9, %v3326_v54  ;;  %v3329_v2 = vpop.permute.xlu0 %3328  ;;  %v400_v6 = vsel %vm385_vm0, %v398_v62, %v399_v16  ;;  %v470_v10 = vsel %vm385_vm0, %v399_v16, 0.0  ;;  %v3499_v9 = vld [vmem:[%s5448_s1 + $0x100] sm:$0xff]  }
  0x97   : > { %v585_v63 = vsel %vm578_vm1, %v372_v15, %v3325_v55  ;;  %v3331_v28 = vunpack.i.h.bf16 %v3329_v2  ;;  %v3330_v29 = vunpack.i.l.bf16 %v3329_v2  ;;  %v4073_v31 = vpack.c.bf16 %v470_v10, %v400_v6  ;;  %v3334_v12 = vpop.permute.xlu1 %3333  ;;  %v3500_v10 = vld [vmem:[%s5448_s1 + $0x108] sm:$0xff]  }
  0x98   : > { %v4071_v27 = vpack.c.bf16 %v586_v0, %v585_v63  ;;  %v402_v21 = vrot.slane %v3793_v24, 1  ;;  %v304_v36 = vrot.slane %v3790_v23, 7  ;;  %v3336_v7 = vunpack.i.h.bf16 %v3334_v12 }
  0x99   : > { %1310 = vmatpush1.bf16.msra.mxu0 %v3492_v18  ;;  %v301_v18 = vrot.slane %v3783_v20, 7  ;;  %v404_v55 = vrot.slane %v3798_v25, 1  ;;  %v405_v24 = vrot.slane %v3801_v26, 1  ;;  %v307_v2 = vrot.slane %v3798_v25, 7 }
  0x9a   : > { %1311 = vmatprep.subr.bf16.mxu0 %v3635_v1  ;;  %v403_v44 = vsel %vm385_vm0, %v401_v34, %v402_v21  ;;  %v471_v45 = vsel %vm385_vm0, %v402_v21, 0.0  ;;  %v306_v62 = vsel %vm288_vm2, %v304_v36, %v305_v47  ;;  %v374_v23 = vsel %vm288_vm2, 0.0, %v304_v36 }
  0x9b   : > { %v303_v13 = vsel %vm288_vm2, %v301_v18, %v302_v19  ;;  %v373_v20 = vsel %vm288_vm2, 0.0, %v301_v18  ;;  %v4101_v54 = vpack.c.bf16 %v471_v45, %v403_v44  ;;  %v590_v16 = vsel %vm578_vm1, %v306_v62, %v3336_v7  ;;  %v3502_v45 = vld [vmem:[%s5448_s1 + $0x118] sm:$0xff]  }
  0x9c   : > { %854 = vmatmul.mubr.bf16.gmra.mrb[4].mxu0 %v4015_v30  ;;  %1098 = vmatmul.mubr.bf16.gmra.mrb[8].mxu1 %v4015_v30  ;;  %v587_v40 = vsel %vm578_vm1, %v373_v20, %v3330_v29  ;;  %v406_v63 = vsel %vm385_vm0, %v404_v55, %v405_v24  ;;  %v472_v0 = vsel %vm385_vm0, %v405_v24, 0.0  ;;  %v308_v6 = vrot.slane %v3801_v26, 7 }
  0x9d   : > { %3032 = vmatprep.mubr.msk.bf16.mxu0 %vm578_vm1, %v4017_v35  ;;  %3060 = vmatprep.mubr.msk.bf16.mxu1 %vm578_vm1, %v4017_v35  ;;  %v407_v29 = vrot.slane %v3817_v32, 1  ;;  %v375_v25 = vsel %vm288_vm2, 0.0, %v307_v2  ;;  %v408_v26 = vrot.slane %v3820_v33, 1  ;;  %v311_v44 = vrot.slane %v3820_v33, 7 }
  0x9e   : > { %1312 = vmatpush1.bf16.msra.mxu0 %v3493_v42  ;;  %v588_v42 = vsel %vm578_vm1, %v303_v13, %v3331_v28  ;;  %v4129_v28 = vpack.c.bf16 %v472_v0, %v406_v63  ;;  %v309_v34 = vsel %vm288_vm2, %v307_v2, %v308_v6  ;;  %v3501_v13 = vld [vmem:[%s5448_s1 + $0x110] sm:$0xff]   ;;  %v411_v33 = vrot.slane %v3833_v38, 1 }
  0x9f   : > { %1313 = vmatprep.subr.bf16.mxu0 %v3635_v1  ;;  %v4099_v49 = vpack.c.bf16 %v588_v42, %v587_v40  ;;  %v409_v40 = vsel %vm385_vm0, %v407_v29, %v408_v26  ;;  %v473_v42 = vsel %vm385_vm0, %v408_v26, 0.0  ;;  %v414_v29 = vrot.slane %v3851_v43, 1 }
  0xa0   : > { %v4157_v7 = vpack.c.bf16 %v473_v42, %v409_v40 }
  0xa1   : > { %v475_v26 = vsel %vm385_vm0, %v414_v29, 0.0 }
  0xa2   : > { %1314 = vmatpush1.bf16.msra.mxu0 %v3494_v50  ;;  %v3335_v50 = vunpack.i.l.bf16 %v3334_v12  ;;  %v310_v12 = vrot.slane %v3817_v32, 7 }
  0xa3   : > { %1315 = vmatprep.subr.bf16.mxu0 %v3635_v1 }
  0xa4   : > { %862 = vmatmul.mubr.bf16.gmra.mrb[8].mxu0 %v4043_v53  ;;  %1106 = vmatmul.mubr.bf16.gmra.mrb[12].mxu1 %v4043_v53  ;;  %v589_v15 = vsel %vm578_vm1, %v374_v23, %v3335_v50  ;;  %v410_v50 = vrot.slane %v3830_v37, 1  ;;  %v312_v55 = vsel %vm288_vm2, %v310_v12, %v311_v44  ;;  %v376_v32 = vsel %vm288_vm2, 0.0, %v310_v12 }
  0xa5   : > { %3033 = vmatprep.mubr.msk.bf16.mxu0 %vm578_vm1, %v4045_v59  ;;  %3061 = vmatprep.mubr.msk.bf16.mxu1 %vm578_vm1, %v4045_v59  ;;  %v4127_v18 = vpack.c.bf16 %v590_v16, %v589_v15  ;;  %v474_v15 = vsel %vm385_vm0, %v411_v33, 0.0  ;;  %v313_v16 = vrot.slane %v3830_v37, 7  ;;  %v416_v12 = vrot.slane %v3861_v46, 1 }
  0xa6   : > { %1316 = vmatpush1.bf16.msra.mxu0 %v3495_v11  ;;  %v3339_v11 = vpop.permute.xlu0 %3338 }
  0xa7   : > { %1317 = vmatprep.subr.bf16.mxu0 %v3635_v1  ;;  %v3341_v19 = vunpack.i.h.bf16 %v3339_v11 }
  0xa9   : > { %v592_v21 = vsel %vm578_vm1, %v309_v34, %v3341_v19 }
  0xaa   : > { %1318 = vmatpush1.bf16.msra.mxu0 %v3496_v22  ;;  %v3340_v22 = vunpack.i.l.bf16 %v3339_v11  ;;  %v3349_v24 = vpop.permute.xlu0 %3348  ;;  %v314_v11 = vrot.slane %v3833_v38, 7 }
  0xab   : > { %1319 = vmatprep.subr.bf16.mxu0 %v3635_v1  ;;  %v3351_v0 = vunpack.i.h.bf16 %v3349_v24  ;;  %v3350_v2 = vunpack.i.l.bf16 %v3349_v24 }
  0xac   : > { %870 = vmatmul.mubr.bf16.gmra.mrb[12].mxu0 %v4071_v27  ;;  %1114 = vmatmul.mubr.bf16.gmra.mrb[16].mxu1 %v4071_v27  ;;  %v591_v20 = vsel %vm578_vm1, %v375_v25, %v3340_v22  ;;  %v315_v19 = vsel %vm288_vm2, %v313_v16, %v314_v11  ;;  %v377_v22 = vsel %vm288_vm2, 0.0, %v313_v16 }
  0xad   : > { %3034 = vmatprep.mubr.msk.bf16.mxu0 %vm578_vm1, %v4073_v31  ;;  %3062 = vmatprep.mubr.msk.bf16.mxu1 %vm578_vm1, %v4073_v31  ;;  %v4155_v36 = vpack.c.bf16 %v592_v21, %v591_v20  ;;  %v595_v37 = vsel %vm578_vm1, %v377_v22, %v3350_v2  ;;  %v596_v38 = vsel %vm578_vm1, %v315_v19, %v3351_v0  ;;  %v317_v20 = vrot.slane %v3851_v43, 7 }
  0xae   : > { %1320 = vmatpush1.bf16.msra.mxu0 %v3497_v39  ;;  %v3344_v39 = vpop.permute.xlu1 %3343  ;;  %v4196_v21 = vpack.c.bf16 %v596_v38, %v595_v37  ;;  %v420_v0 = vrot.slane %v3881_v52, 1  ;;  %v322_v22 = vrot.slane %v3878_v51, 7 }
  0xaf   : > { %1321 = vmatprep.subr.bf16.mxu0 %v3635_v1  ;;  %v3346_v47 = vunpack.i.h.bf16 %v3344_v39 }
  0xb0   : > { %v477_v19 = vsel %vm385_vm0, %v420_v0, 0.0 }
  0xb1   : > { %v594_v23 = vsel %vm578_vm1, %v312_v55, %v3346_v47  ;;  %v417_v47 = vrot.slane %v3868_v48, 1 }
  0xb2   : > { %1322 = vmatpush1.bf16.msra.mxu0 %v3498_v8  ;;  %v3345_v8 = vunpack.i.l.bf16 %v3344_v39  ;;  %v3354_v34 = vpop.permute.xlu1 %3353 }
  0xb3   : > { %1323 = vmatprep.subr.bf16.mxu0 %v3635_v1  ;;  %v3356_v39 = vunpack.i.h.bf16 %v3354_v34  ;;  %v3355_v40 = vunpack.i.l.bf16 %v3354_v34  ;;  %v476_v55 = vsel %vm385_vm0, %v417_v47, 0.0 }
  0xb4   : > { %878 = vmatmul.mubr.bf16.gmra.mrb[16].mxu0 %v4099_v49  ;;  %1122 = vmatmul.mubr.bf16.gmra.mrb[20].mxu1 %v4099_v49  ;;  %v593_v62 = vsel %vm578_vm1, %v376_v32, %v3345_v8  ;;  %v3359_v8 = vpop.permute.xlu0 %3358  ;;  %v319_v32 = vrot.slane %v3861_v46, 7 }
  0xb5   : > { %3035 = vmatprep.mubr.msk.bf16.mxu0 %vm578_vm1, %v4101_v54  ;;  %3063 = vmatprep.mubr.msk.bf16.mxu1 %vm578_vm1, %v4101_v54  ;;  %v4176_v63 = vpack.c.bf16 %v594_v23, %v593_v62  ;;  %v3361_v23 = vunpack.i.h.bf16 %v3359_v8  ;;  %v3360_v24 = vunpack.i.l.bf16 %v3359_v8 }
  0xb6   : > { %1324 = vmatpush1.bf16.msra.mxu0 %v3499_v9  ;;  %v412_v9 = vsel %vm385_vm0, %v410_v50, %v411_v33  ;;  %v418_v50 = vsel %vm385_vm0, %v416_v12, %v417_v47  ;;  %v320_v33 = vrot.slane %v3868_v48, 7  ;;  %v379_v11 = vsel %vm288_vm2, 0.0, %v319_v32  ;;  %v3364_v2 = vpop.permute.xlu1 %3363 }
  0xb7   : > { %1325 = vmatprep.subr.bf16.mxu0 %v3635_v1  ;;  %v4178_v6 = vpack.c.bf16 %v474_v15, %v412_v9  ;;  %v4218_v9 = vpack.c.bf16 %v476_v55, %v418_v50  ;;  %v419_v15 = vrot.slane %v3878_v51, 1  ;;  %v599_v46 = vsel %vm578_vm1, %v379_v11, %v3360_v24 }
  0xb8   : > { %v321_v16 = vsel %vm288_vm2, %v319_v32, %v320_v33  ;;  %v3366_v38 = vunpack.i.h.bf16 %v3364_v2  ;;  %v3365_v34 = vunpack.i.l.bf16 %v3364_v2  ;;  %v326_v47 = vrot.slane %v3900_v58, 7 }
  0xb9   : > { %v600_v48 = vsel %vm578_vm1, %v321_v16, %v3361_v23  ;;  %v425_v55 = vrot.slane %v3908_v60, 1  ;;  %v426_v23 = vrot.slane %v3911_v61, 1  ;;  %v328_v11 = vrot.slane %v3908_v60, 7 }
  0xba   : > { %1326 = vmatpush1.bf16.msra.mxu0 %v3500_v10  ;;  %v413_v10 = vrot.slane %v3843_v41, 1  ;;  %v4236_v37 = vpack.c.bf16 %v600_v48, %v599_v46  ;;  %v3374_v24 = vpop.permute.xlu1 %3373 }
  0xbb   : > { %1327 = vmatprep.subr.bf16.mxu0 %v3635_v1  ;;  %v479_v16 = vsel %vm385_vm0, %v426_v23, 0.0  ;;  %v3376_v48 = vunpack.i.h.bf16 %v3374_v24  ;;  %v3375_v2 = vunpack.i.l.bf16 %v3374_v24 }
  0xbc   : > { %886 = vmatmul.mubr.bf16.gmra.mrb[20].mxu0 %v4127_v18  ;;  %1130 = vmatmul.mubr.bf16.gmra.mrb[24].mxu1 %v4127_v18  ;;  %v415_v25 = vsel %vm385_vm0, %v413_v10, %v414_v29  ;;  %v421_v10 = vsel %vm385_vm0, %v419_v15, %v420_v0  ;;  %v323_v29 = vrot.slane %v3881_v52, 7  ;;  %v427_v15 = vsel %vm385_vm0, %v425_v55, %v426_v23 }
  0xbd   : > { %3036 = vmatprep.mubr.msk.bf16.mxu0 %vm578_vm1, %v4129_v28  ;;  %3064 = vmatprep.mubr.msk.bf16.mxu1 %vm578_vm1, %v4129_v28  ;;  %v4198_v42 = vpack.c.bf16 %v475_v26, %v415_v25  ;;  %v4238_v25 = vpack.c.bf16 %v477_v19, %v421_v10  ;;  %v422_v26 = vrot.slane %v3894_v56, 1  ;;  %v329_v0 = vrot.slane %v3911_v61, 7 }
  0xbe   : > { %1328 = vmatpush1.bf16.msra.mxu0 %v3501_v13  ;;  %v316_v13 = vrot.slane %v3843_v41, 7  ;;  %v4278_v10 = vpack.c.bf16 %v479_v16, %v427_v15  ;;  %v428_v19 = vrot.slane %v3928_v3, 1  ;;  %v335_v23 = vrot.slane %v3944_v17, 7 }
  0xbf   : > { %1329 = vmatprep.subr.bf16.mxu0 %v3635_v1 }
  0xc0   : > { %v318_v44 = vsel %vm288_vm2, %v316_v13, %v317_v20  ;;  %v380_v20 = vsel %vm288_vm2, 0.0, %v322_v22 }
  0xc1   : > { %v598_v43 = vsel %vm578_vm1, %v318_v44, %v3356_v39  ;;  %v423_v39 = vrot.slane %v3900_v58, 1  ;;  %v601_v51 = vsel %vm578_vm1, %v380_v20, %v3365_v34  ;;  %v331_v20 = vrot.slane %v3928_v3, 7 }
  0xc2   : > { %1330 = vmatpush1.bf16.msra.mxu0 %v3502_v45  ;;  %v378_v45 = vsel %vm288_vm2, 0.0, %v316_v13  ;;  %v324_v13 = vsel %vm288_vm2, %v322_v22, %v323_v29  ;;  %v330_v22 = vsel %vm288_vm2, %v328_v11, %v329_v0  ;;  %v382_v29 = vsel %vm288_vm2, 0.0, %v328_v11 }
  0xc3   : > { %2357 = vmatprep.subr.bf16.mxu0 %v3635_v1  ;;  %v597_v41 = vsel %vm578_vm1, %v378_v45, %v3355_v40  ;;  %v602_v52 = vsel %vm578_vm1, %v324_v13, %v3366_v38  ;;  %v3369_v40 = vpop.permute.xlu0 %3368  ;;  %v424_v12 = vsel %vm385_vm0, %v422_v26, %v423_v39  ;;  %v478_v44 = vsel %vm385_vm0, %v423_v39, 0.0 }
  0xc4   : > { %894 = vmatmul.mubr.bf16.gmra.mrb[24].mxu0 %v4155_v36  ;;  %1138 = vmatmul.mubr.bf16.gmra.mrb[28].mxu1 %v4155_v36  ;;  %v4216_v62 = vpack.c.bf16 %v598_v43, %v597_v41  ;;  %v325_v45 = vrot.slane %v3894_v56, 7  ;;  %v4256_v41 = vpack.c.bf16 %v602_v52, %v601_v51  ;;  %v3371_v43 = vunpack.i.h.bf16 %v3369_v40 }
  0xc5   : > { %3037 = vmatprep.mubr.msk.bf16.mxu0 %vm578_vm1, %v4157_v7  ;;  %3065 = vmatprep.mubr.msk.bf16.mxu1 %vm578_vm1, %v4157_v7  ;;  %v3370_v8 = vunpack.i.l.bf16 %v3369_v40  ;;  %v4258_v50 = vpack.c.bf16 %v478_v44, %v424_v12  ;;  %v429_v38 = vrot.slane %v3932_v4, 1  ;;  %v605_v60 = vsel %vm578_vm1, %v382_v29, %v3375_v2  ;;  %v3515_v29 = vld [vmem:[%s5450_s3 + $0x58] sm:$0xff]  }
  0xc6   : > { %v327_v32 = vsel %vm288_vm2, %v325_v45, %v326_v47  ;;  %v381_v33 = vsel %vm288_vm2, 0.0, %v325_v45  ;;  %v606_v61 = vsel %vm578_vm1, %v330_v22, %v3376_v48  ;;  %v332_v39 = vrot.slane %v3932_v4, 7 }
  0xc7   : > { %v603_v56 = vsel %vm578_vm1, %v381_v33, %v3370_v8  ;;  %v604_v58 = vsel %vm578_vm1, %v327_v32, %v3371_v43  ;;  %v3379_v34 = vpop.permute.xlu0 %3378  ;;  %v430_v26 = vsel %vm385_vm0, %v428_v19, %v429_v38  ;;  %v480_v13 = vsel %vm385_vm0, %v429_v38, 0.0  ;;  %v3384_v8 = vpop.permute.xlu1 %3383 }
  0xc8   : > { %v4276_v46 = vpack.c.bf16 %v604_v58, %v603_v56  ;;  %v4296_v51 = vpack.c.bf16 %v606_v61, %v605_v60  ;;  %v3381_v52 = vunpack.i.h.bf16 %v3379_v34  ;;  %v3380_v40 = vunpack.i.l.bf16 %v3379_v34 }
  0xc9   : > { %v4298_v12 = vpack.c.bf16 %v480_v13, %v430_v26  ;;  %v431_v44 = vrot.slane %v3941_v14, 1  ;;  %v333_v45 = vsel %vm288_vm2, %v331_v20, %v332_v39  ;;  %v383_v47 = vsel %vm288_vm2, 0.0, %v331_v20 }
  0xca   : > { %v432_v43 = vrot.slane %v3944_v17, 1  ;;  %v607_v3 = vsel %vm578_vm1, %v383_v47, %v3380_v40  ;;  %v608_v4 = vsel %vm578_vm1, %v333_v45, %v3381_v52  ;;  %v334_v33 = vrot.slane %v3941_v14, 7  ;;  %v3516_v47 = vld [vmem:[%s5450_s3 + $0x68] sm:$0xff]  }
  0xcb   : > { %v4316_v56 = vpack.c.bf16 %v608_v4, %v607_v3  ;;  %v3386_v58 = vunpack.i.h.bf16 %v3384_v8  ;;  %v3385_v24 = vunpack.i.l.bf16 %v3384_v8 }
  0xcc   : > { %902 = vmatmul.mubr.bf16.gmra.mrb[28].mxu0 %v4176_v63  ;;  %1146 = vmatmul.mubr.bf16.gmra.mrb[32].mxu1 %v4176_v63  ;;  %v433_v55 = vsel %vm385_vm0, %v431_v44, %v432_v43  ;;  %v481_v32 = vsel %vm385_vm0, %v432_v43, 0.0  ;;  %v336_v16 = vsel %vm288_vm2, %v334_v33, %v335_v23  ;;  %v384_v11 = vsel %vm288_vm2, 0.0, %v334_v33 }
  0xcd   : > { %3038 = vmatprep.mubr.msk.bf16.mxu0 %vm578_vm1, %v4178_v6  ;;  %3066 = vmatprep.mubr.msk.bf16.mxu1 %vm578_vm1, %v4178_v6  ;;  %v4318_v15 = vpack.c.bf16 %v481_v32, %v433_v55  ;;  %v609_v14 = vsel %vm578_vm1, %v384_v11, %v3385_v24  ;;  %v610_v17 = vsel %vm578_vm1, %v336_v16, %v3386_v58 }
  0xce   : > { %v4328_v0 = vpack.c.bf16 %v610_v17, %v609_v14 }
  0xd4   : > { %910 = vmatmul.mubr.bf16.gmra.mrb[32].mxu0 %v4196_v21  ;;  %1154 = vmatmul.mubr.bf16.gmra.mrb[36].mxu1 %v4196_v21 }
  0xd5   : > { %3039 = vmatprep.mubr.msk.bf16.mxu0 %vm578_vm1, %v4198_v42  ;;  %3067 = vmatprep.mubr.msk.bf16.mxu1 %vm578_vm1, %v4198_v42 }
  0xdc   : > { %918 = vmatmul.mubr.bf16.gmra.mrb[36].mxu0 %v4216_v62  ;;  %1162 = vmatmul.mubr.bf16.gmra.mrb[40].mxu1 %v4216_v62 }
  0xdd   : > { %3040 = vmatprep.mubr.msk.bf16.mxu0 %vm578_vm1, %v4218_v9  ;;  %3068 = vmatprep.mubr.msk.bf16.mxu1 %vm578_vm1, %v4218_v9 }
  0xe4   : > { %926 = vmatmul.mubr.bf16.gmra.mrb[40].mxu0 %v4236_v37  ;;  %1170 = vmatmul.mubr.bf16.gmra.mrb[44].mxu1 %v4236_v37 }
  0xe5   : > { %3041 = vmatprep.mubr.msk.bf16.mxu0 %vm578_vm1, %v4238_v25  ;;  %3069 = vmatprep.mubr.msk.bf16.mxu1 %vm578_vm1, %v4238_v25 }
  0xec   : > { %934 = vmatmul.mubr.bf16.gmra.mrb[44].mxu0 %v4256_v41  ;;  %1178 = vmatmul.mubr.bf16.gmra.mrb[48].mxu1 %v4256_v41 }
  0xed   : > { %3042 = vmatprep.mubr.msk.bf16.mxu0 %vm578_vm1, %v4258_v50  ;;  %3070 = vmatprep.mubr.msk.bf16.mxu1 %vm578_vm1, %v4258_v50 }
  0xf4   : > { %942 = vmatmul.mubr.bf16.gmra.mrb[48].mxu0 %v4276_v46  ;;  %1186 = vmatmul.mubr.bf16.gmra.mrb[52].mxu1 %v4276_v46 }
  0xf5   : > { %3043 = vmatprep.mubr.msk.bf16.mxu0 %vm578_vm1, %v4278_v10  ;;  %3071 = vmatprep.mubr.msk.bf16.mxu1 %vm578_vm1, %v4278_v10 }
  0xfc   : > { %950 = vmatmul.mubr.bf16.gmra.mrb[52].mxu0 %v4296_v51  ;;  %1194 = vmatmul.mubr.bf16.gmra.mrb[56].mxu1 %v4296_v51 }
  0xfd   : > { %3044 = vmatprep.mubr.msk.bf16.mxu0 %vm578_vm1, %v4298_v12  ;;  %3072 = vmatprep.mubr.msk.bf16.mxu1 %vm578_vm1, %v4298_v12 }
 0x104   : > { %958 = vmatmul.mubr.bf16.gmra.mrb[56].mxu0 %v4316_v56  ;;  %1202 = vmatmul.mubr.bf16.gmra.mrb[60].mxu1 %v4316_v56 }
 0x105   : > { %3045 = vmatprep.mubr.msk.bf16.mxu0 %vm578_vm1, %v4318_v15 }
 0x10c   : > { %966 = vmatmul.mubr.bf16.gmra.mrb[60].mxu0 %v4328_v0 }
 0x10d   : > { %3109 = vmatprep.mubr.msk.bf16.mxu0 %vm578_vm1, %v3996_v57  ;;  %v3503_v57 = vld [vmem:[%s5450_s3] sm:$0xff]  }
 0x111   : > { %v1083_v48 = vpop.f32.mrb[0].mxu1 }
 0x112   : > { %v1085_v2 = vpop.f32.mrb[1].mxu1 }
 0x113   : > { %v1086_v19 = vpop.f32.mrb[2].mxu1 }
 0x114   : > { %1340 = vmatmul.mubr.bf16.vlgmr.msra.gmra.mrb[64].mxu0 %v4015_v30  ;;  %v1088_v22 = vpop.f32.mrb[3].mxu1  ;;  %v3504_v30 = vld [vmem:[%s5450_s3 + $0x8] sm:$0xff]  }
 0x115   : > { %3110 = vmatprep.mubr.msk.bf16.mxu0 %vm578_vm1, %v4017_v35  ;;  %2358 = vmatpush1.bf16.msra.mxu0 %v3503_v57  ;;  %v3505_v35 = vld [vmem:[%s5450_s3 + $0x10] sm:$0xff]  }
 0x116   : > { %2359 = vmatprep.subr.bf16.mxu0 %v3635_v1 }
 0x119   : > { %2360 = vmatpush1.bf16.msra.mxu0 %v3504_v30 }
 0x11a   : > { %2361 = vmatprep.subr.bf16.mxu0 %v3635_v1 }
 0x11c   : > { %1348 = vmatmul.mubr.bf16.gmra.mrb[68].mxu0 %v4043_v53  ;;  %v3506_v53 = vld [vmem:[%s5450_s3 + $0x18] sm:$0xff]  }
 0x11d   : > { %3111 = vmatprep.mubr.msk.bf16.mxu0 %vm578_vm1, %v4045_v59  ;;  %2362 = vmatpush1.bf16.msra.mxu0 %v3505_v35  ;;  %v3507_v59 = vld [vmem:[%s5450_s3 + $0x20] sm:$0xff]  }
 0x11e   : > { %2363 = vmatprep.subr.bf16.mxu0 %v3635_v1 }
 0x121   : > { %2364 = vmatpush1.bf16.msra.mxu0 %v3506_v53 }
 0x122   : > { %2365 = vmatprep.subr.bf16.mxu0 %v3635_v1 }
 0x124   : > { %1356 = vmatmul.mubr.bf16.gmra.mrb[72].mxu0 %v4071_v27  ;;  %v3508_v27 = vld [vmem:[%s5450_s3 + $0x28] sm:$0xff]  }
 0x125   : > { %3112 = vmatprep.mubr.msk.bf16.mxu0 %vm578_vm1, %v4073_v31  ;;  %2366 = vmatpush1.bf16.msra.mxu0 %v3507_v59  ;;  %v3509_v31 = vld [vmem:[%s5450_s3 + $0x30] sm:$0xff]  }
 0x126   : > { %2367 = vmatprep.subr.bf16.mxu0 %v3635_v1 }
 0x129   : > { %2368 = vmatpush1.bf16.msra.mxu0 %v3508_v27 }
 0x12a   : > { %2369 = vmatprep.subr.bf16.mxu0 %v3635_v1 }
 0x12c   : > { %1364 = vmatmul.mubr.bf16.gmra.mrb[76].mxu0 %v4099_v49  ;;  %v3510_v49 = vld [vmem:[%s5450_s3 + $0x38] sm:$0xff]  }
 0x12d   : > { %3113 = vmatprep.mubr.msk.bf16.mxu0 %vm578_vm1, %v4101_v54  ;;  %2370 = vmatpush1.bf16.msra.mxu0 %v3509_v31  ;;  %v3511_v54 = vld [vmem:[%s5450_s3 + $0x40] sm:$0xff]  }
 0x12e   : > { %2371 = vmatprep.subr.bf16.mxu0 %v3635_v1 }
 0x131   : > { %2372 = vmatpush1.bf16.msra.mxu0 %v3510_v49 }
 0x132   : > { %2373 = vmatprep.subr.bf16.mxu0 %v3635_v1 }
 0x134   : > { %1372 = vmatmul.mubr.bf16.gmra.mrb[80].mxu0 %v4127_v18 }
 0x135   : > { %3114 = vmatprep.mubr.msk.bf16.mxu0 %vm578_vm1, %v4129_v28  ;;  %2374 = vmatpush1.bf16.msra.mxu0 %v3511_v54  ;;  %v3518_v54 = vld [vmem:[%s5450_s3 + $0x78] sm:$0xff]  }
 0x136   : > { %2375 = vmatprep.subr.bf16.mxu0 %v3635_v1 }
 0x13c   : > { %1380 = vmatmul.mubr.bf16.gmra.mrb[84].mxu0 %v4155_v36  ;;  %v3512_v36 = vld [vmem:[%s5450_s3 + $0x48] sm:$0xff]  }
 0x13d   : > { %3115 = vmatprep.mubr.msk.bf16.mxu0 %vm578_vm1, %v4157_v7  ;;  %2376 = vmatpush1.bf16.msra.mxu0 %v3512_v36 }
 0x13e   : > { %2377 = vmatprep.subr.bf16.mxu0 %v3635_v1 }
 0x144   : > { %1388 = vmatmul.mubr.bf16.gmra.mrb[88].mxu0 %v4176_v63 }
 0x145   : > { %3116 = vmatprep.mubr.msk.bf16.mxu0 %vm578_vm1, %v4178_v6 }
 0x14c   : > { %1396 = vmatmul.mubr.bf16.gmra.mrb[92].mxu0 %v4196_v21 }
 0x14d   : > { %3117 = vmatprep.mubr.msk.bf16.mxu0 %vm578_vm1, %v4198_v42 }
 0x154   : > { %1404 = vmatmul.mubr.bf16.gmra.mrb[96].mxu0 %v4216_v62 }
 0x155   : > { %3118 = vmatprep.mubr.msk.bf16.mxu0 %vm578_vm1, %v4218_v9 }
 0x15c   : > { %1412 = vmatmul.mubr.bf16.gmra.mrb[100].mxu0 %v4236_v37 }
 0x15d   : > { %3119 = vmatprep.mubr.msk.bf16.mxu0 %vm578_vm1, %v4238_v25  ;;  %v3514_v25 = vld [vmem:[%s5450_s3 + $0x50] sm:$0xff]  }
 0x15e   : > { %2378 = vmatpush1.bf16.msra.mxu0 %v3514_v25 }
 0x15f   : > { %2379 = vmatprep.subr.bf16.mxu0 %v3635_v1 }
 0x162   : > { %2380 = vmatpush1.bf16.msra.mxu0 %v3515_v29 }
 0x164   : > { %1420 = vmatmul.mubr.bf16.gmra.mrb[104].mxu0 %v4256_v41 }
 0x165   : > { %3120 = vmatprep.mubr.msk.bf16.mxu0 %vm578_vm1, %v4258_v50 }
 0x167   : > { %v847_v18 = vpop.f32.mrb[0].mxu0  ;;  %v1091_v28 = vpop.f32.mrb[4].mxu1 }
 0x168   : > { %v4405_v7 = vadd.f32 %v1083_v48, %v847_v18  ;;  %v849_v63 = vpop.f32.mrb[1].mxu0  ;;  %v1093_v6 = vpop.f32.mrb[5].mxu1 }
 0x169   : > { %v850_v21 = vpop.f32.mrb[2].mxu0  ;;  %v1094_v42 = vpop.f32.mrb[6].mxu1 }
 0x16a   : > { %v4407_v62 = vadd.f32 %v1086_v19, %v850_v21  ;;  %v852_v9 = vpop.f32.mrb[3].mxu0  ;;  %v1096_v37 = vpop.f32.mrb[7].mxu1 }
 0x16c   : > { %1428 = vmatmul.mubr.bf16.gmra.mrb[108].mxu0 %v4276_v46  ;;  %v3513_v46 = vld [vmem:[%s5450_s3 + $0x60] sm:$0xff]  }
 0x16d   : > { %3121 = vmatprep.mubr.msk.bf16.mxu0 %vm578_vm1, %v4278_v10  ;;  %2125 = vmatpush1.bf16.msra.mxu1 %v3513_v46 }
 0x16e   : > { %2126 = vmatprep.subr.bf16.mxu1 %v3635_v1 }
 0x16f   : > { %v855_v41 = vpop.f32.mrb[4].mxu0  ;;  %v1099_v50 = vpop.f32.mrb[8].mxu1 }
 0x170   : > { %v4420_v38 = vadd.f32 %v1091_v28, %v855_v41  ;;  %v857_v60 = vpop.f32.mrb[5].mxu0  ;;  %v1101_v61 = vpop.f32.mrb[9].mxu1  ;;  %v3519_v41 = vld [vmem:[%s5450_s3 + $0x80] sm:$0xff]  }
 0x171   : > { %v858_v34 = vpop.f32.mrb[6].mxu0  ;;  %v1102_v26 = vpop.f32.mrb[10].mxu1  ;;  %2127 = vmatpush1.bf16.msra.mxu1 %v3516_v47 }
 0x172   : > { %v4425_v10 = vadd.f32 %v1094_v42, %v858_v34  ;;  %v860_v13 = vpop.f32.mrb[7].mxu0  ;;  %v1104_v20 = vpop.f32.mrb[11].mxu1  ;;  %2128 = vmatprep.subr.bf16.mxu1 %v3635_v1 }
 0x174   : > { %1436 = vmatmul.mubr.bf16.gmra.mrb[112].mxu0 %v4296_v51 }
 0x175   : > { %3122 = vmatprep.mubr.msk.bf16.mxu0 %vm578_vm1, %v4298_v12 }
 0x177   : > { %v863_v39 = vpop.f32.mrb[8].mxu0  ;;  %v1107_v52 = vpop.f32.mrb[12].mxu1 }
 0x178   : > { %v4431_v40 = vadd.f32 %v1099_v50, %v863_v39  ;;  %v865_v44 = vpop.f32.mrb[9].mxu0  ;;  %v1109_v45 = vpop.f32.mrb[13].mxu1 }
 0x179   : > { %v866_v43 = vpop.f32.mrb[10].mxu0  ;;  %v1110_v3 = vpop.f32.mrb[14].mxu1 }
 0x17a   : > { %v4436_v4 = vadd.f32 %v1102_v26, %v866_v43  ;;  %v868_v8 = vpop.f32.mrb[11].mxu0  ;;  %v1112_v55 = vpop.f32.mrb[15].mxu1 }
 0x17c   : > { %1444 = vmatmul.mubr.bf16.gmra.mrb[116].mxu0 %v4316_v56  ;;  %v3517_v56 = vld [vmem:[%s5450_s3 + $0x70] sm:$0xff]  }
 0x17d   : > { %3123 = vmatprep.mubr.msk.bf16.mxu0 %vm578_vm1, %v4318_v15  ;;  %2129 = vmatpush1.bf16.msra.mxu1 %v3517_v56 }
 0x17e   : > { %2130 = vmatprep.subr.bf16.mxu1 %v3635_v1 }
 0x17f   : > { %v871_v51 = vpop.f32.mrb[12].mxu0  ;;  %v1115_v12 = vpop.f32.mrb[16].mxu1 }
 0x180   : > { %v4442_v32 = vadd.f32 %v1107_v52, %v871_v51  ;;  %v873_v33 = vpop.f32.mrb[13].mxu0  ;;  %v1117_v23 = vpop.f32.mrb[17].mxu1 }
 0x181   : > { %v874_v58 = vpop.f32.mrb[14].mxu0  ;;  %v1118_v24 = vpop.f32.mrb[18].mxu1  ;;  %2131 = vmatpush1.bf16.msra.mxu1 %v3518_v54 }
 0x182   : > { %v4444_v16 = vadd.f32 %v1110_v3, %v874_v58  ;;  %v876_v11 = vpop.f32.mrb[15].mxu0  ;;  %v1120_v14 = vpop.f32.mrb[19].mxu1  ;;  %2132 = vmatprep.subr.bf16.mxu1 %v3635_v1  ;;  %v3520_v3 = vld [vmem:[%s5450_s3 + $0x88] sm:$0xff]  }
 0x184   : > { %1452 = vmatmul.mubr.bf16.gmra.mrb[120].mxu0 %v4328_v0 }
 0x185   : > { %1459 = vmatprep.mubr.bf16.mxu0 %v5453_v5  ;;  %2133 = vmatpush1.bf16.msra.mxu1 %v3519_v41 }
 0x186   : > { %2134 = vmatprep.subr.bf16.mxu1 %v3635_v1 }
 0x187   : > { %v879_v15 = vpop.f32.mrb[16].mxu0  ;;  %v1123_v17 = vpop.f32.mrb[20].mxu1 }
 0x188   : > { %v4451_v48 = vadd.f32 %v1115_v12, %v879_v15  ;;  %v881_v2 = vpop.f32.mrb[17].mxu0  ;;  %v1125_v19 = vpop.f32.mrb[21].mxu1 }
 0x189   : > { %v882_v22 = vpop.f32.mrb[18].mxu0  ;;  %v1126_v57 = vpop.f32.mrb[22].mxu1  ;;  %2135 = vmatpush1.bf16.msra.mxu1 %v3520_v3 }
 0x18a   : > { %v4454_v30 = vadd.f32 %v1118_v24, %v882_v22  ;;  %v884_v0 = vpop.f32.mrb[19].mxu0  ;;  %v1128_v35 = vpop.f32.mrb[23].mxu1  ;;  %2136 = vmatprep.subr.bf16.mxu1 %v3635_v1  ;;  %v3521_v22 = vld [vmem:[%s5450_s3 + $0x90] sm:$0xff]  }
 0x18c   : > { %1460 = vmatmul.mubr.bf16.gmra.mrb[124].mxu0 %v5453_v5 }
 0x18d   : > { %2389 = vmatprep.mubr.bf16.mxu0 %v5453_v5  ;;  %2137 = vmatpush1.bf16.msra.mxu1 %v3521_v22  ;;  %v3524_v22 = vld [vmem:[%s5450_s3 + $0xa8] sm:$0xff]  }
 0x18e   : > { %2138 = vmatprep.subr.bf16.mxu1 %v3635_v1 }
 0x18f   : > { %v887_v53 = vpop.f32.mrb[20].mxu0  ;;  %v1131_v59 = vpop.f32.mrb[24].mxu1 }
 0x190   : > { %v4458_v27 = vadd.f32 %v1123_v17, %v887_v53  ;;  %v889_v31 = vpop.f32.mrb[21].mxu0  ;;  %v1133_v49 = vpop.f32.mrb[25].mxu1 }
 0x191   : > { %v890_v18 = vpop.f32.mrb[22].mxu0  ;;  %v1134_v28 = vpop.f32.mrb[26].mxu1 }
 0x192   : > { %v4463_v36 = vadd.f32 %v1126_v57, %v890_v18  ;;  %v892_v63 = vpop.f32.mrb[23].mxu0  ;;  %v1136_v6 = vpop.f32.mrb[27].mxu1 }
 0x193   : > { %v3522_v63 = vld [vmem:[%s5450_s3 + $0x98] sm:$0xff]  }
 0x194   : > { %2390 = vmatmul.mubr.bf16.vlgmr.msra.gmra.mrb[128].mxu0 %v5453_v5  ;;  %2139 = vmatpush1.bf16.msra.mxu1 %v3522_v63 }
 0x195   : > { %2140 = vmatprep.subr.bf16.mxu1 %v3635_v1 }
 0x197   : > { %v895_v21 = vpop.f32.mrb[24].mxu0  ;;  %v1139_v42 = vpop.f32.mrb[28].mxu1 }
 0x198   : > { %v4467_v9 = vadd.f32 %v1131_v59, %v895_v21  ;;  %v897_v37 = vpop.f32.mrb[25].mxu0  ;;  %v1141_v25 = vpop.f32.mrb[29].mxu1 }
 0x199   : > { %v898_v50 = vpop.f32.mrb[26].mxu0  ;;  %v1142_v29 = vpop.f32.mrb[30].mxu1 }
 0x19a   : > { %v4472_v60 = vadd.f32 %v1134_v28, %v898_v50  ;;  %v900_v61 = vpop.f32.mrb[27].mxu0  ;;  %v1144_v46 = vpop.f32.mrb[31].mxu1 }
 0x19f   : > { %v903_v34 = vpop.f32.mrb[28].mxu0  ;;  %v1147_v26 = vpop.f32.mrb[32].mxu1 }
 0x1a0   : > { %v4475_v13 = vadd.f32 %v1139_v42, %v903_v34  ;;  %v905_v20 = vpop.f32.mrb[29].mxu0  ;;  %v1149_v39 = vpop.f32.mrb[33].mxu1 }
 0x1a1   : > { %v906_v52 = vpop.f32.mrb[30].mxu0  ;;  %v1150_v44 = vpop.f32.mrb[34].mxu1 }
 0x1a2   : > { %v4477_v45 = vadd.f32 %v1142_v29, %v906_v52  ;;  %v908_v47 = vpop.f32.mrb[31].mxu0  ;;  %v1152_v43 = vpop.f32.mrb[35].mxu1 }
 0x1a7   : > { %v911_v8 = vpop.f32.mrb[32].mxu0  ;;  %v1155_v55 = vpop.f32.mrb[36].mxu1 }
 0x1a8   : > { %v4482_v51 = vadd.f32 %v1147_v26, %v911_v8  ;;  %v913_v12 = vpop.f32.mrb[33].mxu0  ;;  %v1157_v33 = vpop.f32.mrb[37].mxu1 }
 0x1a9   : > { %v914_v23 = vpop.f32.mrb[34].mxu0  ;;  %v1158_v58 = vpop.f32.mrb[38].mxu1 }
 0x1aa   : > { %v4485_v24 = vadd.f32 %v1150_v44, %v914_v23  ;;  %v916_v11 = vpop.f32.mrb[35].mxu0  ;;  %v1160_v14 = vpop.f32.mrb[39].mxu1  ;;  %v3523_v44 = vld [vmem:[%s5450_s3 + $0xa0] sm:$0xff]  }
 0x1ab   : > { %2141 = vmatpush1.bf16.msra.mxu1 %v3523_v44 }
 0x1ac   : > { %2142 = vmatprep.subr.bf16.mxu1 %v3635_v1 }
 0x1af   : > { %v919_v56 = vpop.f32.mrb[36].mxu0  ;;  %v1163_v15 = vpop.f32.mrb[40].mxu1  ;;  %2143 = vmatpush1.bf16.msra.mxu1 %v3524_v22 }
 0x1b0   : > { %v4487_v17 = vadd.f32 %v1155_v55, %v919_v56  ;;  %v921_v2 = vpop.f32.mrb[37].mxu0  ;;  %v1165_v19 = vpop.f32.mrb[41].mxu1  ;;  %2144 = vmatprep.subr.bf16.mxu1 %v3635_v1 }
 0x1b1   : > { %v922_v57 = vpop.f32.mrb[38].mxu0  ;;  %v1166_v0 = vpop.f32.mrb[42].mxu1 }
 0x1b2   : > { %v4492_v35 = vadd.f32 %v1158_v58, %v922_v57  ;;  %v924_v53 = vpop.f32.mrb[39].mxu0  ;;  %v1168_v59 = vpop.f32.mrb[43].mxu1 }
 0x1b7   : > { %v927_v31 = vpop.f32.mrb[40].mxu0  ;;  %v1171_v49 = vpop.f32.mrb[44].mxu1 }
 0x1b8   : > { %v4495_v54 = vadd.f32 %v1163_v15, %v927_v31  ;;  %v929_v18 = vpop.f32.mrb[41].mxu0  ;;  %v1173_v28 = vpop.f32.mrb[45].mxu1 }
 0x1b9   : > { %v930_v6 = vpop.f32.mrb[42].mxu0  ;;  %v1174_v21 = vpop.f32.mrb[46].mxu1 }
 0x1ba   : > { %v4500_v42 = vadd.f32 %v1166_v0, %v930_v6  ;;  %v932_v37 = vpop.f32.mrb[43].mxu0  ;;  %v1176_v25 = vpop.f32.mrb[47].mxu1 }
 0x1bf   : > { %v935_v41 = vpop.f32.mrb[44].mxu0  ;;  %v1179_v50 = vpop.f32.mrb[48].mxu1 }
 0x1c0   : > { %v4503_v29 = vadd.f32 %v1171_v49, %v935_v41  ;;  %v937_v61 = vpop.f32.mrb[45].mxu0  ;;  %v1181_v46 = vpop.f32.mrb[49].mxu1 }
 0x1c1   : > { %v938_v34 = vpop.f32.mrb[46].mxu0  ;;  %v1182_v26 = vpop.f32.mrb[50].mxu1 }
 0x1c2   : > { %v4505_v20 = vadd.f32 %v1174_v21, %v938_v34  ;;  %v940_v39 = vpop.f32.mrb[47].mxu0  ;;  %v1184_v52 = vpop.f32.mrb[51].mxu1  ;;  %v3525_v21 = vld [vmem:[%s5450_s3 + $0xb0] sm:$0xff]  }
 0x1c3   : > { %2145 = vmatpush1.bf16.msra.mxu1 %v3525_v21 }
 0x1c4   : > { %2146 = vmatprep.subr.bf16.mxu1 %v3635_v1 }
 0x1c7   : > { %v943_v47 = vpop.f32.mrb[48].mxu0  ;;  %v1187_v43 = vpop.f32.mrb[52].mxu1 }
 0x1c8   : > { %v4510_v3 = vadd.f32 %v1179_v50, %v943_v47  ;;  %v945_v8 = vpop.f32.mrb[49].mxu0  ;;  %v1189_v55 = vpop.f32.mrb[53].mxu1  ;;  %v3526_v47 = vld [vmem:[%s5450_s3 + $0xb8] sm:$0xff]  }
 0x1c9   : > { %v946_v12 = vpop.f32.mrb[50].mxu0  ;;  %v1190_v33 = vpop.f32.mrb[54].mxu1  ;;  %v4541_v8 = vld [vmem:[%s5449_s2] ss:$0 sm:$0xff]  ;;  %2147 = vmatpush1.bf16.msra.mxu1 %v3526_v47 }
 0x1ca   : > { %v4513_v23 = vadd.f32 %v1182_v26, %v946_v12  ;;  %v948_v58 = vpop.f32.mrb[51].mxu0  ;;  %v1192_v11 = vpop.f32.mrb[55].mxu1  ;;  %2615 = vmatprep.subr.bf16.mxu1 %v3635_v1 }
 0x1cf   : > { %v951_v14 = vpop.f32.mrb[52].mxu0  ;;  %v1195_v56 = vpop.f32.mrb[56].mxu1 }
 0x1d0   : > { %v4515_v15 = vadd.f32 %v1187_v43, %v951_v14  ;;  %v953_v2 = vpop.f32.mrb[53].mxu0  ;;  %v1197_v19 = vpop.f32.mrb[57].mxu1 }
 0x1d1   : > { %v954_v57 = vpop.f32.mrb[54].mxu0  ;;  %v1198_v0 = vpop.f32.mrb[58].mxu1 }
 0x1d2   : > { %v4520_v53 = vadd.f32 %v1190_v33, %v954_v57  ;;  %v956_v59 = vpop.f32.mrb[55].mxu0  ;;  %v1200_v31 = vpop.f32.mrb[59].mxu1 }
 0x1d7   : > { %v959_v49 = vpop.f32.mrb[56].mxu0  ;;  %v1203_v18 = vpop.f32.mrb[60].mxu1 }
 0x1d8   : > { %v4523_v28 = vadd.f32 %v1195_v56, %v959_v49  ;;  %v961_v63 = vpop.f32.mrb[57].mxu0  ;;  %v1205_v6 = vpop.f32.mrb[61].mxu1 }
 0x1d9   : > { %v962_v37 = vpop.f32.mrb[58].mxu0  ;;  %v1206_v25 = vpop.f32.mrb[62].mxu1 }
 0x1da   : > { %v4528_v41 = vadd.f32 %v1198_v0, %v962_v37  ;;  %v964_v50 = vpop.f32.mrb[59].mxu0  ;;  %v1208_v61 = vpop.f32.mrb[63].mxu1 }
 0x1df   : > { %v967_v46 = vpop.f32.mrb[60].mxu0 }
 0x1e0   : > { %v4531_v34 = vadd.f32 %v1203_v18, %v967_v46  ;;  %v969_v26 = vpop.f32.mrb[61].mxu0 }
 0x1e1   : > { %v970_v39 = vpop.f32.mrb[62].mxu0 }
 0x1e2   : > { %v4533_v52 = vadd.f32 %v1206_v25, %v970_v39  ;;  %v972_v44 = vpop.f32.mrb[63].mxu0 }
 0x1e7   : > { %v1341_v43 = vpop.f32.mrb[64].mxu0 }
 0x1e8   : > { %v1468_v55 = vadd.f32 %v1341_v43, %v4405_v7  ;;  %v1343_v12 = vpop.f32.mrb[65].mxu0 }
 0x1e9   : > { %v1344_v33 = vpop.f32.mrb[66].mxu0 }
 0x1ea   : > { %v1507_v58 = vadd.f32 %v4541_v8, %v1468_v55  ;;  %v1469_v11 = vadd.f32 %v1344_v33, %v4407_v62  ;;  %v1346_v14 = vpop.f32.mrb[67].mxu0 }
 0x1ec   : > { %v4547_v56 = vmax.f32 %v1507_v58, 0.0  ;;  %v1508_v2 = vadd.f32 %v4541_v8, %v1469_v11 }
 0x1ee   : > { %v1540_v19 = vmax.f32 %v1508_v2, 0.0  ;;  %v1699_v22 = vrot.slane %v4547_v56, 1  ;;  %v1603_v18 = vrot.slane %v4547_v56, 7 }
 0x1ef   : > { %v1349_v57 = vpop.f32.mrb[68].mxu0 }
 0x1f0   : > { %v1604_v0 = vrot.slane %v1540_v19, 7  ;;  %v1700_v59 = vrot.slane %v1540_v19, 1  ;;  %v1470_v7 = vadd.f32 %v1349_v57, %v4420_v38  ;;  %v1351_v31 = vpop.f32.mrb[69].mxu0  ;;  %v3387_v49 = vpack.i.bf16 %v1540_v19, %v4547_v56 }
 0x1f1   : > { %v1352_v63 = vpop.f32.mrb[70].mxu0 }
 0x1f2   : > { %v1509_v62 = vadd.f32 %v4541_v8, %v1470_v7  ;;  %v1471_v6 = vadd.f32 %v1352_v63, %v4425_v10  ;;  %3388 = vrot.lane.b32.xlu0 %v3387_v49, %s3637_s26  ;;  %v1354_v21 = vpop.f32.mrb[71].mxu0  ;;  %v1701_v37 = vsel %vm385_vm0, %v1699_v22, %v1700_v59  ;;  %v1779_v25 = vsel %vm385_vm0, %v1700_v59, 0.0 }
 0x1f3   : > { %v1924_v50 = vpack.c.bf16 %v1779_v25, %v1701_v37  ;;  %v4562_v38 = vsel %vm288_vm2, %v1603_v18, %v1604_v0 }
 0x1f4   : > { %v4564_v61 = vmax.f32 %v1509_v62, 0.0  ;;  %v1510_v46 = vadd.f32 %v4541_v8, %v1471_v6 }
 0x1f5   : > { %3161 = vmatprep.mubr.msk.bf16.mxu1 %vm578_vm1, %v1924_v50  ;;  %3189 = vmatprep.mubr.msk.bf16.mxu0 %vm578_vm1, %v1924_v50 }
 0x1f6   : > { %v1542_v10 = vmax.f32 %v1510_v46, 0.0  ;;  %v1702_v26 = vrot.slane %v4564_v61, 1  ;;  %v1606_v33 = vrot.slane %v4564_v61, 7 }
 0x1f7   : > { %v1357_v39 = vpop.f32.mrb[72].mxu0 }
 0x1f8   : > { %v1607_v44 = vrot.slane %v1542_v10, 7  ;;  %v1703_v47 = vrot.slane %v1542_v10, 1  ;;  %v1472_v43 = vadd.f32 %v1357_v39, %v4431_v40  ;;  %v1359_v55 = vpop.f32.mrb[73].mxu0  ;;  %v3392_v12 = vpack.i.bf16 %v1542_v10, %v4564_v61 }
 0x1f9   : > { %v1360_v58 = vpop.f32.mrb[74].mxu0 }
 0x1fa   : > { %v1511_v11 = vadd.f32 %v4541_v8, %v1472_v43  ;;  %v1473_v14 = vadd.f32 %v1360_v58, %v4436_v4  ;;  %3393 = vrot.lane.b32.xlu1 %v3392_v12, %s3637_s26  ;;  %v1362_v2 = vpop.f32.mrb[75].mxu0  ;;  %v1704_v19 = vsel %vm385_vm0, %v1702_v26, %v1703_v47  ;;  %v1780_v22 = vsel %vm385_vm0, %v1703_v47, 0.0 }
 0x1fb   : > { %v4578_v57 = vpack.c.bf16 %v1780_v22, %v1704_v19  ;;  %v4583_v40 = vsel %vm288_vm2, %v1606_v33, %v1607_v44 }
 0x1fc   : > { %v4585_v0 = vmax.f32 %v1511_v11, 0.0  ;;  %v1512_v59 = vadd.f32 %v4541_v8, %v1473_v14 }
 0x1fe   : > { %v1544_v7 = vmax.f32 %v1512_v59, 0.0  ;;  %v1705_v4 = vrot.slane %v4585_v0, 1  ;;  %v5466_v37 = vrot.slane %v4585_v0, 7 }
 0x1ff   : > { %v1365_v31 = vpop.f32.mrb[76].mxu0 }
 0x200   : > { %v1610_v49 = vrot.slane %v1544_v7, 7  ;;  %v1706_v63 = vrot.slane %v1544_v7, 1  ;;  %v1474_v62 = vadd.f32 %v1365_v31, %v4442_v32  ;;  %v1367_v6 = vpop.f32.mrb[77].mxu0  ;;  %v3397_v21 = vpack.i.bf16 %v1544_v7, %v4585_v0 }
 0x201   : > { %v1368_v25 = vpop.f32.mrb[78].mxu0 }
 0x202   : > { %v1513_v50 = vadd.f32 %v4541_v8, %v1474_v62  ;;  %v1475_v46 = vadd.f32 %v1368_v25, %v4444_v16  ;;  %3398 = vrot.lane.b32.xlu0 %v3397_v21, %s3637_s26  ;;  %v1370_v10 = vpop.f32.mrb[79].mxu0  ;;  %v1707_v26 = vsel %vm385_vm0, %v1705_v4, %v1706_v63  ;;  %v1781_v39 = vsel %vm385_vm0, %v1706_v63, 0.0 }
 0x203   : > { %v4597_v44 = vpack.c.bf16 %v1781_v39, %v1707_v26  ;;  %v4602_v32 = vsel %vm288_vm2, %v5466_v37, %v1610_v49 }
 0x204   : > { %v4604_v47 = vmax.f32 %v1513_v50, 0.0  ;;  %v1514_v43 = vadd.f32 %v4541_v8, %v1475_v46 }
 0x206   : > { %v1546_v55 = vmax.f32 %v1514_v43, 0.0  ;;  %v1708_v16 = vrot.slane %v4604_v47, 1  ;;  %v5464_v22 = vrot.slane %v4604_v47, 7 }
 0x207   : > { %v1373_v12 = vpop.f32.mrb[80].mxu0 }
 0x208   : > { %v1613_v58 = vrot.slane %v1546_v55, 7  ;;  %v1709_v11 = vrot.slane %v1546_v55, 1  ;;  %v1476_v14 = vadd.f32 %v1373_v12, %v4451_v48  ;;  %v1375_v2 = vpop.f32.mrb[81].mxu0  ;;  %v3402_v19 = vpack.i.bf16 %v1546_v55, %v4604_v47 }
 0x209   : > { %v1376_v59 = vpop.f32.mrb[82].mxu0 }
 0x20a   : > { %v1515_v7 = vadd.f32 %v4541_v8, %v1476_v14  ;;  %v1477_v4 = vadd.f32 %v1376_v59, %v4454_v30  ;;  %3403 = vrot.lane.b32.xlu1 %v3402_v19, %s3637_s26  ;;  %v1378_v31 = vpop.f32.mrb[83].mxu0  ;;  %v1710_v49 = vsel %vm385_vm0, %v1708_v16, %v1709_v11  ;;  %v1782_v63 = vsel %vm385_vm0, %v1709_v11, 0.0 }
 0x20b   : > { %v4616_v62 = vpack.c.bf16 %v1782_v63, %v1710_v49  ;;  %v4621_v48 = vsel %vm288_vm2, %v5464_v22, %v1613_v58 }
 0x20c   : > { %v4623_v6 = vmax.f32 %v1515_v7, 0.0  ;;  %v1516_v21 = vadd.f32 %v4541_v8, %v1477_v4 }
 0x20e   : > { %v1548_v25 = vmax.f32 %v1516_v21, 0.0  ;;  %v1711_v30 = vrot.slane %v4623_v6, 1  ;;  %v5462_v55 = vrot.slane %v4623_v6, 7 }
 0x20f   : > { %v1381_v50 = vpop.f32.mrb[84].mxu0 }
 0x210   : > { %v1616_v46 = vrot.slane %v1548_v25, 7  ;;  %v1712_v10 = vrot.slane %v1548_v25, 1  ;;  %v1478_v26 = vadd.f32 %v1381_v50, %v4458_v27  ;;  %v1383_v39 = vpop.f32.mrb[85].mxu0  ;;  %v3407_v43 = vpack.i.bf16 %v1548_v25, %v4623_v6 }
 0x211   : > { %v1384_v16 = vpop.f32.mrb[86].mxu0 }
 0x212   : > { %v1517_v12 = vadd.f32 %v4541_v8, %v1478_v26  ;;  %v1479_v58 = vadd.f32 %v1384_v16, %v4463_v36  ;;  %3408 = vrot.lane.b32.xlu0 %v3407_v43, %s3637_s26  ;;  %v1386_v11 = vpop.f32.mrb[87].mxu0  ;;  %v1713_v14 = vsel %vm385_vm0, %v1711_v30, %v1712_v10  ;;  %v1783_v2 = vsel %vm385_vm0, %v1712_v10, 0.0 }
 0x213   : > { %v4635_v19 = vpack.c.bf16 %v1783_v2, %v1713_v14  ;;  %v4640_v27 = vsel %vm288_vm2, %v5462_v55, %v1616_v46 }
 0x214   : > { %v4642_v59 = vmax.f32 %v1517_v12, 0.0  ;;  %v1518_v7 = vadd.f32 %v4541_v8, %v1479_v58 }
 0x216   : > { %v1550_v4 = vmax.f32 %v1518_v7, 0.0  ;;  %v1714_v36 = vrot.slane %v4642_v59, 1  ;;  %v5460_v50 = vrot.slane %v4642_v59, 7 }
 0x217   : > { %v1389_v31 = vpop.f32.mrb[88].mxu0 }
 0x218   : > { %v1619_v49 = vrot.slane %v1550_v4, 7  ;;  %v1715_v63 = vrot.slane %v1550_v4, 1  ;;  %v1480_v21 = vadd.f32 %v1389_v31, %v4467_v9  ;;  %v1391_v25 = vpop.f32.mrb[89].mxu0  ;;  %v3412_v30 = vpack.i.bf16 %v1550_v4, %v4642_v59 }
 0x219   : > { %v1392_v10 = vpop.f32.mrb[90].mxu0 }
 0x21a   : > { %v1519_v46 = vadd.f32 %v4541_v8, %v1480_v21  ;;  %v1481_v26 = vadd.f32 %v1392_v10, %v4472_v60  ;;  %3413 = vrot.lane.b32.xlu1 %v3412_v30, %s3637_s26  ;;  %v1394_v39 = vpop.f32.mrb[91].mxu0  ;;  %v1716_v43 = vsel %vm385_vm0, %v1714_v36, %v1715_v63  ;;  %v1784_v16 = vsel %vm385_vm0, %v1715_v63, 0.0 }
 0x21b   : > { %v4654_v12 = vpack.c.bf16 %v1784_v16, %v1716_v43  ;;  %v4659_v9 = vsel %vm288_vm2, %v5460_v50, %v1619_v49 }
 0x21c   : > { %v4661_v58 = vmax.f32 %v1519_v46, 0.0  ;;  %v1520_v11 = vadd.f32 %v4541_v8, %v1481_v26 }
 0x21e   : > { %v1552_v14 = vmax.f32 %v1520_v11, 0.0  ;;  %v1717_v60 = vrot.slane %v4661_v58, 1  ;;  %v5458_v21 = vrot.slane %v4661_v58, 7 }
 0x21f   : > { %v1397_v2 = vpop.f32.mrb[92].mxu0 }
 0x220   : > { %v1622_v7 = vrot.slane %v1552_v14, 7  ;;  %v1718_v4 = vrot.slane %v1552_v14, 1  ;;  %v1482_v36 = vadd.f32 %v1397_v2, %v4475_v13  ;;  %v1399_v31 = vpop.f32.mrb[93].mxu0  ;;  %v3417_v63 = vpack.i.bf16 %v1552_v14, %v4661_v58 }
 0x221   : > { %v1400_v25 = vpop.f32.mrb[94].mxu0 }
 0x222   : > { %v1521_v49 = vadd.f32 %v4541_v8, %v1482_v36  ;;  %v1483_v30 = vadd.f32 %v1400_v25, %v4477_v45  ;;  %3418 = vrot.lane.b32.xlu0 %v3417_v63, %s3637_s26  ;;  %v1402_v10 = vpop.f32.mrb[95].mxu0  ;;  %v1719_v46 = vsel %vm385_vm0, %v1717_v60, %v1718_v4  ;;  %v1785_v26 = vsel %vm385_vm0, %v1718_v4, 0.0 }
 0x223   : > { %v4673_v39 = vpack.c.bf16 %v1785_v26, %v1719_v46  ;;  %v4678_v13 = vsel %vm288_vm2, %v5458_v21, %v1622_v7 }
 0x224   : > { %v4680_v43 = vmax.f32 %v1521_v49, 0.0  ;;  %v1522_v16 = vadd.f32 %v4541_v8, %v1483_v30 }
 0x226   : > { %v1554_v11 = vmax.f32 %v1522_v16, 0.0  ;;  %v1720_v45 = vrot.slane %v4680_v43, 1  ;;  %v5456_v63 = vrot.slane %v4680_v43, 7 }
 0x227   : > { %v1405_v14 = vpop.f32.mrb[96].mxu0 }
 0x228   : > { %v1625_v2 = vrot.slane %v1554_v11, 7  ;;  %v1721_v36 = vrot.slane %v1554_v11, 1  ;;  %v1484_v60 = vadd.f32 %v1405_v14, %v4482_v51  ;;  %v1407_v4 = vpop.f32.mrb[97].mxu0  ;;  %v3422_v31 = vpack.i.bf16 %v1554_v11, %v4680_v43 }
 0x229   : > { %v1408_v25 = vpop.f32.mrb[98].mxu0 }
 0x22a   : > { %v1523_v7 = vadd.f32 %v4541_v8, %v1484_v60  ;;  %v1485_v49 = vadd.f32 %v1408_v25, %v4485_v24  ;;  %3423 = vrot.lane.b32.xlu1 %v3422_v31, %s3637_s26  ;;  %v1410_v30 = vpop.f32.mrb[99].mxu0  ;;  %v1722_v10 = vsel %vm385_vm0, %v1720_v45, %v1721_v36  ;;  %v1786_v46 = vsel %vm385_vm0, %v1721_v36, 0.0 }
 0x22b   : > { %v4692_v26 = vpack.c.bf16 %v1786_v46, %v1722_v10  ;;  %v4697_v51 = vsel %vm288_vm2, %v5456_v63, %v1625_v2 }
 0x22c   : > { %v4699_v16 = vmax.f32 %v1523_v7, 0.0  ;;  %v1524_v11 = vadd.f32 %v4541_v8, %v1485_v49 }
 0x22e   : > { %v1556_v14 = vmax.f32 %v1524_v11, 0.0  ;;  %v1723_v24 = vrot.slane %v4699_v16, 1  ;;  %v5455_v30 = vrot.slane %v4699_v16, 7 }
 0x22f   : > { %v1413_v60 = vpop.f32.mrb[100].mxu0 }
 0x230   : > { %v1628_v4 = vrot.slane %v1556_v14, 7  ;;  %v1724_v31 = vrot.slane %v1556_v14, 1  ;;  %v1486_v45 = vadd.f32 %v1413_v60, %v4487_v17  ;;  %v1415_v36 = vpop.f32.mrb[101].mxu0  ;;  %v3427_v25 = vpack.i.bf16 %v1556_v14, %v4699_v16 }
 0x231   : > { %v1416_v10 = vpop.f32.mrb[102].mxu0 }
 0x232   : > { %v1525_v2 = vadd.f32 %v4541_v8, %v1486_v45  ;;  %v1487_v7 = vadd.f32 %v1416_v10, %v4492_v35  ;;  %3428 = vrot.lane.b32.xlu0 %v3427_v25, %s3637_s26  ;;  %v1418_v49 = vpop.f32.mrb[103].mxu0  ;;  %v1725_v46 = vsel %vm385_vm0, %v1723_v24, %v1724_v31  ;;  %v1787_v11 = vsel %vm385_vm0, %v1724_v31, 0.0 }
 0x233   : > { %v4711_v5 = vpack.c.bf16 %v1787_v11, %v1725_v46  ;;  %v4716_v17 = vsel %vm288_vm2, %v5455_v30, %v1628_v4 }
 0x234   : > { %v4718_v14 = vmax.f32 %v1525_v2, 0.0  ;;  %v1526_v60 = vadd.f32 %v4541_v8, %v1487_v7 }
 0x236   : > { %v1558_v45 = vmax.f32 %v1526_v60, 0.0  ;;  %v1726_v35 = vrot.slane %v4718_v14, 1  ;;  %v5457_v46 = vrot.slane %v4718_v14, 7 }
 0x237   : > { %v1421_v36 = vpop.f32.mrb[104].mxu0 }
 0x238   : > { %v1631_v25 = vrot.slane %v1558_v45, 7  ;;  %v1727_v10 = vrot.slane %v1558_v45, 1  ;;  %v1488_v24 = vadd.f32 %v1421_v36, %v4495_v54  ;;  %v1423_v31 = vpop.f32.mrb[105].mxu0  ;;  %v3432_v49 = vpack.i.bf16 %v1558_v45, %v4718_v14 }
 0x239   : > { %v1424_v11 = vpop.f32.mrb[106].mxu0 }
 0x23a   : > { %v1527_v4 = vadd.f32 %v4541_v8, %v1488_v24  ;;  %v1489_v2 = vadd.f32 %v1424_v11, %v4500_v42  ;;  %3433 = vrot.lane.b32.xlu1 %v3432_v49, %s3637_s26  ;;  %v1426_v7 = vpop.f32.mrb[107].mxu0  ;;  %v1728_v60 = vsel %vm385_vm0, %v1726_v35, %v1727_v10  ;;  %v1788_v30 = vsel %vm385_vm0, %v1727_v10, 0.0 }
 0x23b   : > { %v4730_v63 = vpack.c.bf16 %v1788_v30, %v1728_v60  ;;  %v4735_v54 = vsel %vm288_vm2, %v5457_v46, %v1631_v25 }
 0x23c   : > { %v4737_v45 = vmax.f32 %v1527_v4, 0.0  ;;  %v1528_v36 = vadd.f32 %v4541_v8, %v1489_v2 }
 0x23e   : > { %v1560_v24 = vmax.f32 %v1528_v36, 0.0  ;;  %v1729_v42 = vrot.slane %v4737_v45, 1  ;;  %v5459_v7 = vrot.slane %v4737_v45, 7 }
 0x23f   : > { %v1429_v31 = vpop.f32.mrb[108].mxu0 }
 0x240   : > { %v1634_v49 = vrot.slane %v1560_v24, 7  ;;  %v1730_v11 = vrot.slane %v1560_v24, 1  ;;  %v1490_v35 = vadd.f32 %v1429_v31, %v4503_v29  ;;  %v1431_v10 = vpop.f32.mrb[109].mxu0  ;;  %v3437_v30 = vpack.i.bf16 %v1560_v24, %v4737_v45 }
 0x241   : > { %v1432_v60 = vpop.f32.mrb[110].mxu0 }
 0x242   : > { %v1529_v25 = vadd.f32 %v4541_v8, %v1490_v35  ;;  %v1491_v4 = vadd.f32 %v1432_v60, %v4505_v20  ;;  %3438 = vrot.lane.b32.xlu0 %v3437_v30, %s3637_s26  ;;  %v1434_v2 = vpop.f32.mrb[111].mxu0  ;;  %v1731_v36 = vsel %vm385_vm0, %v1729_v42, %v1730_v11  ;;  %v1789_v46 = vsel %vm385_vm0, %v1730_v11, 0.0 }
 0x243   : > { %v4749_v21 = vpack.c.bf16 %v1789_v46, %v1731_v36  ;;  %v4754_v29 = vsel %vm288_vm2, %v5459_v7, %v1634_v49 }
 0x244   : > { %v4756_v24 = vmax.f32 %v1529_v25, 0.0  ;;  %v1530_v31 = vadd.f32 %v4541_v8, %v1491_v4 }
 0x246   : > { %v1562_v35 = vmax.f32 %v1530_v31, 0.0  ;;  %v1732_v20 = vrot.slane %v4756_v24, 1  ;;  %v5461_v2 = vrot.slane %v4756_v24, 7 }
 0x247   : > { %v1437_v10 = vpop.f32.mrb[112].mxu0 }
 0x248   : > { %v1637_v30 = vrot.slane %v1562_v35, 7  ;;  %v1733_v60 = vrot.slane %v1562_v35, 1  ;;  %v1492_v42 = vadd.f32 %v1437_v10, %v4510_v3  ;;  %v1439_v11 = vpop.f32.mrb[113].mxu0  ;;  %v3442_v46 = vpack.i.bf16 %v1562_v35, %v4756_v24 }
 0x249   : > { %v1440_v36 = vpop.f32.mrb[114].mxu0 }
 0x24a   : > { %v1531_v49 = vadd.f32 %v4541_v8, %v1492_v42  ;;  %v1493_v25 = vadd.f32 %v1440_v36, %v4513_v23  ;;  %3443 = vrot.lane.b32.xlu1 %v3442_v46, %s3637_s26  ;;  %v1442_v4 = vpop.f32.mrb[115].mxu0  ;;  %v1734_v31 = vsel %vm385_vm0, %v1732_v20, %v1733_v60  ;;  %v1790_v7 = vsel %vm385_vm0, %v1733_v60, 0.0 }
 0x24b   : > { %v4768_v50 = vpack.c.bf16 %v1790_v7, %v1734_v31  ;;  %v4773_v3 = vsel %vm288_vm2, %v5461_v2, %v1637_v30 }
 0x24c   : > { %v4775_v35 = vmax.f32 %v1531_v49, 0.0  ;;  %v1532_v10 = vadd.f32 %v4541_v8, %v1493_v25 }
 0x24e   : > { %v1564_v42 = vmax.f32 %v1532_v10, 0.0  ;;  %v1735_v23 = vrot.slane %v4775_v35, 1  ;;  %v5463_v4 = vrot.slane %v4775_v35, 7 }
 0x24f   : > { %v1445_v11 = vpop.f32.mrb[116].mxu0 }
 0x250   : > { %v1640_v46 = vrot.slane %v1564_v42, 7  ;;  %v1736_v36 = vrot.slane %v1564_v42, 1  ;;  %v1494_v20 = vadd.f32 %v1445_v11, %v4515_v15  ;;  %v1447_v60 = vpop.f32.mrb[117].mxu0  ;;  %v3447_v7 = vpack.i.bf16 %v1564_v42, %v4775_v35 }
 0x251   : > { %v1448_v31 = vpop.f32.mrb[118].mxu0 }
 0x252   : > { %v1533_v30 = vadd.f32 %v4541_v8, %v1494_v20  ;;  %v1495_v49 = vadd.f32 %v1448_v31, %v4520_v53  ;;  %3448 = vrot.lane.b32.xlu0 %v3447_v7, %s3637_s26  ;;  %v1450_v25 = vpop.f32.mrb[119].mxu0  ;;  %v1737_v10 = vsel %vm385_vm0, %v1735_v23, %v1736_v36  ;;  %v1791_v2 = vsel %vm385_vm0, %v1736_v36, 0.0 }
 0x253   : > { %v4787_v55 = vpack.c.bf16 %v1791_v2, %v1737_v10  ;;  %v4792_v15 = vsel %vm288_vm2, %v5463_v4, %v1640_v46 }
 0x254   : > { %v4794_v42 = vmax.f32 %v1533_v30, 0.0  ;;  %v1534_v11 = vadd.f32 %v4541_v8, %v1495_v49 }
 0x256   : > { %v1566_v20 = vmax.f32 %v1534_v11, 0.0  ;;  %v1738_v53 = vrot.slane %v4794_v42, 1  ;;  %v5465_v25 = vrot.slane %v4794_v42, 7 }
 0x257   : > { %v1453_v60 = vpop.f32.mrb[120].mxu0 }
 0x258   : > { %v1643_v7 = vrot.slane %v1566_v20, 7  ;;  %v1739_v31 = vrot.slane %v1566_v20, 1  ;;  %v1496_v23 = vadd.f32 %v1453_v60, %v4523_v28  ;;  %v1455_v36 = vpop.f32.mrb[121].mxu0  ;;  %v3452_v2 = vpack.i.bf16 %v1566_v20, %v4794_v42 }
 0x259   : > { %v1456_v10 = vpop.f32.mrb[122].mxu0 }
 0x25a   : > { %v1535_v46 = vadd.f32 %v4541_v8, %v1496_v23  ;;  %v1497_v30 = vadd.f32 %v1456_v10, %v4528_v41  ;;  %3453 = vrot.lane.b32.xlu1 %v3452_v2, %s3637_s26  ;;  %v1458_v49 = vpop.f32.mrb[123].mxu0  ;;  %v1740_v11 = vsel %vm385_vm0, %v1738_v53, %v1739_v31  ;;  %v1792_v4 = vsel %vm385_vm0, %v1739_v31, 0.0 }
 0x25b   : > { %v4806_v22 = vpack.c.bf16 %v1792_v4, %v1740_v11  ;;  %v4811_v28 = vsel %vm288_vm2, %v5465_v25, %v1643_v7 }
 0x25c   : > { %v4813_v20 = vmax.f32 %v1535_v46, 0.0  ;;  %v1536_v60 = vadd.f32 %v4541_v8, %v1497_v30 }
 0x25e   : > { %v1568_v23 = vmax.f32 %v1536_v60, 0.0  ;;  %v1741_v41 = vrot.slane %v4813_v20, 1  ;;  %v1645_v49 = vrot.slane %v4813_v20, 7 }
 0x25f   : > { %v1461_v36 = vpop.f32.mrb[124].mxu0 }
 0x260   : > { %v1646_v2 = vrot.slane %v1568_v23, 7  ;;  %v1742_v10 = vrot.slane %v1568_v23, 1  ;;  %v1498_v53 = vadd.f32 %v1461_v36, %v4531_v34  ;;  %v1463_v31 = vpop.f32.mrb[125].mxu0  ;;  %v3457_v4 = vpack.i.bf16 %v1568_v23, %v4813_v20 }
 0x261   : > { %v1464_v11 = vpop.f32.mrb[126].mxu0 }
 0x262   : > { %v1537_v7 = vadd.f32 %v4541_v8, %v1498_v53  ;;  %v1499_v46 = vadd.f32 %v1464_v11, %v4533_v52  ;;  %3458 = vrot.lane.b32.xlu0 %v3457_v4, %s3637_s26  ;;  %v1466_v30 = vpop.f32.mrb[127].mxu0  ;;  %v1743_v60 = vsel %vm385_vm0, %v1741_v41, %v1742_v10  ;;  %v1793_v25 = vsel %vm385_vm0, %v1742_v10, 0.0 }
 0x263   : > { %v4825_v37 = vpack.c.bf16 %v1793_v25, %v1743_v60  ;;  %v4830_v34 = vsel %vm288_vm2, %v1645_v49, %v1646_v2  ;;  %v1683_v41 = vsel %vm288_vm2, 0.0, %v1603_v18 }
 0x264   : > { %v4832_v23 = vmax.f32 %v1537_v7, 0.0  ;;  %v1538_v36 = vadd.f32 %v4541_v8, %v1499_v46  ;;  %v3389_v53 = vpop.permute.xlu0 %3388  ;;  %v3527_v8 = vld [vmem:[%s5450_s3 + $0xc0] sm:$0xff]  }
 0x265   : > { %v3391_v52 = vunpack.i.h.bf16 %v3389_v53  ;;  %v3390_v31 = vunpack.i.l.bf16 %v3389_v53 }
 0x266   : > { %v1570_v4 = vmax.f32 %v1538_v36, 0.0  ;;  %v1648_v25 = vrot.slane %v4832_v23, 7  ;;  %v1744_v10 = vrot.slane %v4832_v23, 1 }
 0x267   : > { %v1891_v11 = vsel %vm578_vm1, %v1683_v41, %v3390_v31  ;;  %v1892_v2 = vsel %vm578_vm1, %v4562_v38, %v3391_v52  ;;  %v3528_v38 = vld [vmem:[%s5450_s3 + $0xc8] sm:$0xff]   ;;  %v1684_v41 = vsel %vm288_vm2, 0.0, %v1606_v33  ;;  %v3530_v33 = vld [vmem:[%s5450_s3 + $0xd8] sm:$0xff]  }
 0x268   : > { %v1649_v7 = vrot.slane %v1570_v4, 7  ;;  %v1745_v46 = vrot.slane %v1570_v4, 1  ;;  %v1923_v30 = vpack.c.bf16 %v1892_v2, %v1891_v11  ;;  %v3462_v56 = vpack.i.bf16 %v1570_v4, %v4832_v23 }
 0x269   : > { %v1698_v20 = vsel %vm288_vm2, 0.0, %v1648_v25 }
 0x26a   : > { %2157 = vmatmul.mubr.bf16.vlgmr.msra.gmra.mrb[64].mxu1 %v1923_v30  ;;  %2398 = vmatmul.mubr.bf16.gmra.mrb[132].mxu0 %v1923_v30  ;;  %v1746_v18 = vsel %vm385_vm0, %v1744_v10, %v1745_v46  ;;  %v1794_v60 = vsel %vm385_vm0, %v1745_v46, 0.0  ;;  %v4852_v36 = vsel %vm288_vm2, %v1648_v25, %v1649_v7  ;;  %v5469_v46 = vrot.slane %v4585_v0, 7 }
 0x26b   : > { %2616 = vmatpush1.bf16.msra.mxu1 %v3527_v8  ;;  %3463 = vrot.lane.b32.xlu1 %v3462_v56, %s3637_s26  ;;  %v4858_v53 = vpack.c.bf16 %v1794_v60, %v1746_v18  ;;  %v3529_v8 = vld [vmem:[%s5450_s3 + $0xd0] sm:$0xff]   ;;  %s3571_s26 = scalar_lea.vmem %s5397_s30, 4096 }
 0x26c   : > { %3162 = vmatprep.mubr.msk.bf16.mxu1 %vm578_vm1, %v4578_v57  ;;  %3190 = vmatprep.mubr.msk.bf16.mxu0 %vm578_vm1, %v4578_v57  ;;  %v3394_v52 = vpop.permute.xlu1 %3393  ;;  %v1685_v30 = vsel %vm288_vm2, 0.0, %v5469_v46  ;;  %p3572_p11 = scmp.ne.s32.totalorder %s5397_s30, %s3571_s26  ;;  %p3579_p1 = scmp.lt.s32.totalorder %s3577_s11, %s3571_s26 }
 0x26d   : > { %v3396_v31 = vunpack.i.h.bf16 %v3394_v52  ;;  %v3395_v4 = vunpack.i.l.bf16 %v3394_v52  ;;  %2617 = vmatprep.subr.bf16.mxu1 %v3635_v1 }
 0x26e   : > { %p3573_p12 = pnand %p3572_p11, %p3709_p5  ;;  %p3580_p2 = por %p3579_p1, %p3578_p0 }
 0x26f   : > { %v1893_v10 = vsel %vm578_vm1, %v1684_v41, %v3395_v4  ;;  %v1894_v11 = vsel %vm578_vm1, %v4583_v40, %v3396_v31  ;;  %2618 = vmatpush1.bf16.msra.mxu1 %v3528_v38  ;;  %v3531_v38 = vld [vmem:[%s5450_s3 + $0xe0] sm:$0xff]   ;;  %v5470_v4 = vrot.slane %v4604_v47, 7 }
 0x270   : > { %v4871_v2 = vpack.c.bf16 %v1894_v11, %v1893_v10  ;;  %2619 = vmatprep.subr.bf16.mxu1 %v3635_v1  ;;  %p3574_p13 = pneg %p3573_p12 }
 0x271   : > { %v1686_v41 = vsel %vm288_vm2, 0.0, %v5470_v4 }
 0x272   : > { %2165 = vmatmul.mubr.bf16.gmra.mrb[68].mxu1 %v4871_v2  ;;  %2406 = vmatmul.mubr.bf16.gmra.mrb[136].mxu0 %v4871_v2  ;;  %p3581_p3 = pnand %p3580_p2, %p3574_p13 }
 0x273   : > { %3163 = vmatprep.mubr.msk.bf16.mxu1 %vm578_vm1, %v4597_v44  ;;  %3191 = vmatprep.mubr.msk.bf16.mxu0 %vm578_vm1, %v4597_v44 }
 0x274   : > { %v3399_v61 = vpop.permute.xlu0 %3398  ;;  %2620 = vmatpush1.bf16.msra.mxu1 %v3529_v8 }
 0x275   : > { %v3401_v40 = vunpack.i.h.bf16 %v3399_v61  ;;  %v3400_v7 = vunpack.i.l.bf16 %v3399_v61  ;;  %2621 = vmatprep.subr.bf16.mxu1 %v3635_v1  ;;  %v3533_v61 = vld [vmem:[%s5450_s3 + $0xf0] sm:$0xff]  }
 0x277   : > { %v1895_v56 = vsel %vm578_vm1, %v1685_v30, %v3400_v7  ;;  %v1896_v18 = vsel %vm578_vm1, %v4602_v32, %v3401_v40  ;;  %v3532_v32 = vld [vmem:[%s5450_s3 + $0xe8] sm:$0xff]   ;;  %v5471_v7 = vrot.slane %v4623_v6, 7 }
 0x278   : > { %v4893_v60 = vpack.c.bf16 %v1896_v18, %v1895_v56  ;;  %2622 = vmatpush1.bf16.msra.mxu1 %v3530_v33 }
 0x279   : > { %2623 = vmatprep.subr.bf16.mxu1 %v3635_v1  ;;  %v1687_v46 = vsel %vm288_vm2, 0.0, %v5471_v7 }
 0x27a   : > { %2173 = vmatmul.mubr.bf16.gmra.mrb[72].mxu1 %v4893_v60  ;;  %2414 = vmatmul.mubr.bf16.gmra.mrb[140].mxu0 %v4893_v60 }
 0x27b   : > { %3164 = vmatprep.mubr.msk.bf16.mxu1 %vm578_vm1, %v4616_v62  ;;  %3192 = vmatprep.mubr.msk.bf16.mxu0 %vm578_vm1, %v4616_v62 }
 0x27c   : > { %v3404_v0 = vpop.permute.xlu1 %3403  ;;  %2624 = vmatpush1.bf16.msra.mxu1 %v3531_v38  ;;  %v3535_v38 = vld [vmem:[%s5450_s3 + $0x100] sm:$0xff]  }
 0x27d   : > { %v3406_v52 = vunpack.i.h.bf16 %v3404_v0  ;;  %v3405_v31 = vunpack.i.l.bf16 %v3404_v0  ;;  %2625 = vmatprep.subr.bf16.mxu1 %v3635_v1 }
 0x27f   : > { %v1897_v10 = vsel %vm578_vm1, %v1686_v41, %v3405_v31  ;;  %v1898_v11 = vsel %vm578_vm1, %v4621_v48, %v3406_v52  ;;  %v3534_v48 = vld [vmem:[%s5450_s3 + $0xf8] sm:$0xff]   ;;  %v5472_v52 = vrot.slane %v4642_v59, 7 }
 0x280   : > { %v4915_v8 = vpack.c.bf16 %v1898_v11, %v1897_v10  ;;  %2626 = vmatpush1.bf16.msra.mxu1 %v3532_v32  ;;  %v3537_v11 = vld [vmem:[%s5450_s3 + $0x110] sm:$0xff]  }
 0x281   : > { %2627 = vmatprep.subr.bf16.mxu1 %v3635_v1  ;;  %v1688_v31 = vsel %vm288_vm2, 0.0, %v5472_v52  ;;  %v5475_v52 = vrot.slane %v4699_v16, 7 }
 0x282   : > { %2181 = vmatmul.mubr.bf16.gmra.mrb[76].mxu1 %v4915_v8  ;;  %2422 = vmatmul.mubr.bf16.gmra.mrb[144].mxu0 %v4915_v8 }
 0x283   : > { %3165 = vmatprep.mubr.msk.bf16.mxu1 %vm578_vm1, %v4635_v19  ;;  %3193 = vmatprep.mubr.msk.bf16.mxu0 %vm578_vm1, %v4635_v19 }
 0x284   : > { %v3409_v47 = vpop.permute.xlu0 %3408  ;;  %2628 = vmatpush1.bf16.msra.mxu1 %v3533_v61 }
 0x285   : > { %v3411_v33 = vunpack.i.h.bf16 %v3409_v47  ;;  %v3410_v40 = vunpack.i.l.bf16 %v3409_v47  ;;  %2629 = vmatprep.subr.bf16.mxu1 %v3635_v1 }
 0x287   : > { %v1899_v30 = vsel %vm578_vm1, %v1687_v46, %v3410_v40  ;;  %v1900_v56 = vsel %vm578_vm1, %v4640_v27, %v3411_v33  ;;  %v3536_v27 = vld [vmem:[%s5450_s3 + $0x108] sm:$0xff]  }
 0x288   : > { %v4937_v18 = vpack.c.bf16 %v1900_v56, %v1899_v30  ;;  %2630 = vmatpush1.bf16.msra.mxu1 %v3534_v48  ;;  %v5473_v48 = vrot.slane %v4661_v58, 7  ;;  %v5474_v56 = vrot.slane %v4680_v43, 7 }
 0x289   : > { %2631 = vmatprep.subr.bf16.mxu1 %v3635_v1 }
 0x28a   : > { %2189 = vmatmul.mubr.bf16.gmra.mrb[80].mxu1 %v4937_v18  ;;  %2430 = vmatmul.mubr.bf16.gmra.mrb[148].mxu0 %v4937_v18  ;;  %v1689_v33 = vsel %vm288_vm2, 0.0, %v5473_v48 }
 0x28b   : > { %3166 = vmatprep.mubr.msk.bf16.mxu1 %vm578_vm1, %v4654_v12  ;;  %3194 = vmatprep.mubr.msk.bf16.mxu0 %vm578_vm1, %v4654_v12 }
 0x28c   : > { %v3414_v6 = vpop.permute.xlu1 %3413  ;;  %2632 = vmatpush1.bf16.msra.mxu1 %v3535_v38 }
 0x28d   : > { %v3416_v0 = vunpack.i.h.bf16 %v3414_v6  ;;  %v3415_v32 = vunpack.i.l.bf16 %v3414_v6  ;;  %2633 = vmatprep.subr.bf16.mxu1 %v3635_v1 }
 0x28f   : > { %v1901_v4 = vsel %vm578_vm1, %v1688_v31, %v3415_v32  ;;  %v1902_v41 = vsel %vm578_vm1, %v4659_v9, %v3416_v0  ;;  %v3538_v9 = vld [vmem:[%s5450_s3 + $0x118] sm:$0xff]   ;;  %v1691_v31 = vsel %vm288_vm2, 0.0, %v5475_v52 }
 0x290   : > { %v4959_v10 = vpack.c.bf16 %v1902_v41, %v1901_v4  ;;  %2634 = vmatpush1.bf16.msra.mxu1 %v3536_v27 }
 0x291   : > { %2635 = vmatprep.subr.bf16.mxu1 %v3635_v1 }
 0x292   : > { %2197 = vmatmul.mubr.bf16.gmra.mrb[84].mxu1 %v4959_v10  ;;  %2438 = vmatmul.mubr.bf16.gmra.mrb[152].mxu0 %v4959_v10 }
 0x293   : > { %3167 = vmatprep.mubr.msk.bf16.mxu1 %vm578_vm1, %v4673_v39  ;;  %3195 = vmatprep.mubr.msk.bf16.mxu0 %vm578_vm1, %v4673_v39 }
 0x294   : > { %v3419_v59 = vpop.permute.xlu0 %3418  ;;  %2636 = vmatpush1.bf16.msra.mxu1 %v3537_v11 }
 0x295   : > { %v3421_v61 = vunpack.i.h.bf16 %v3419_v59  ;;  %v3420_v47 = vunpack.i.l.bf16 %v3419_v59  ;;  %2637 = vmatprep.subr.bf16.mxu1 %v3635_v1 }
 0x297   : > { %v1903_v40 = vsel %vm578_vm1, %v1689_v33, %v3420_v47  ;;  %v1904_v7 = vsel %vm578_vm1, %v4678_v13, %v3421_v61  ;;  %v1690_v13 = vsel %vm288_vm2, 0.0, %v5474_v56  ;;  %v5031_v33 = vpop.f32.mrb[128].mxu0 }
 0x298   : > { %v4981_v46 = vpack.c.bf16 %v1904_v7, %v1903_v40  ;;  %2638 = vmatpush1.bf16.msra.mxu1 %v3538_v9  ;;  %v5476_v9 = vrot.slane %v4718_v14, 7 }
 0x29a   : > { %2205 = vmatmul.mubr.bf16.gmra.mrb[88].mxu1 %v4981_v46  ;;  %2446 = vmatmul.mubr.bf16.gmra.mrb[156].mxu0 %v4981_v46  ;;  %v1692_v61 = vsel %vm288_vm2, 0.0, %v5476_v9 }
 0x29b   : > { %3168 = vmatprep.mubr.msk.bf16.mxu1 %vm578_vm1, %v4692_v26  ;;  %3196 = vmatprep.mubr.msk.bf16.mxu0 %vm578_vm1, %v4692_v26 }
 0x29c   : > { %v3424_v1 = vpop.permute.xlu1 %3423 }
 0x29d   : > { %v3426_v58 = vunpack.i.h.bf16 %v3424_v1  ;;  %v3425_v30 = vunpack.i.l.bf16 %v3424_v1  ;;  %v2393_v1 = vpop.f32.mrb[129].mxu0 }
 0x29f   : > { %v1905_v38 = vsel %vm578_vm1, %v1690_v13, %v3425_v30  ;;  %v1906_v6 = vsel %vm578_vm1, %v4697_v51, %v3426_v58 }
 0x2a0   : > { %v4995_v27 = vpack.c.bf16 %v1906_v6, %v1905_v38 }
 0x2a2   : > { %2213 = vmatmul.mubr.bf16.gmra.mrb[92].mxu1 %v4995_v27  ;;  %2454 = vmatmul.mubr.bf16.gmra.mrb[160].mxu0 %v4995_v27 }
 0x2a3   : > { %3169 = vmatprep.mubr.msk.bf16.mxu1 %vm578_vm1, %v4711_v5  ;;  %3197 = vmatprep.mubr.msk.bf16.mxu0 %vm578_vm1, %v4711_v5 }
 0x2a4   : > { %v3429_v43 = vpop.permute.xlu0 %3428 }
 0x2a5   : > { %v3431_v0 = vunpack.i.h.bf16 %v3429_v43  ;;  %v3430_v32 = vunpack.i.l.bf16 %v3429_v43 }
 0x2a7   : > { %v1907_v51 = vsel %vm578_vm1, %v1691_v31, %v3430_v32  ;;  %v1908_v4 = vsel %vm578_vm1, %v4716_v17, %v3431_v0 }
 0x2a8   : > { %v5009_v41 = vpack.c.bf16 %v1908_v4, %v1907_v51 }
 0x2aa   : > { %2221 = vmatmul.mubr.bf16.gmra.mrb[96].mxu1 %v5009_v41  ;;  %2462 = vmatmul.mubr.bf16.gmra.mrb[164].mxu0 %v5009_v41 }
 0x2ab   : > { %3170 = vmatprep.mubr.msk.bf16.mxu1 %vm578_vm1, %v4730_v63  ;;  %3198 = vmatprep.mubr.msk.bf16.mxu0 %vm578_vm1, %v4730_v63 }
 0x2ac   : > { %v3434_v16 = vpop.permute.xlu1 %3433 }
 0x2ad   : > { %v3436_v11 = vunpack.i.h.bf16 %v3434_v16  ;;  %v3435_v59 = vunpack.i.l.bf16 %v3434_v16 }
 0x2af   : > { %v1909_v17 = vsel %vm578_vm1, %v1692_v61, %v3435_v59  ;;  %v1910_v47 = vsel %vm578_vm1, %v4735_v54, %v3436_v11  ;;  %v5477_v54 = vrot.slane %v4737_v45, 7  ;;  %v5047_v45 = vpop.f32.mrb[130].mxu0  ;;  %v5479_v11 = vrot.slane %v4775_v35, 7 }
 0x2b0   : > { %v5023_v48 = vpack.c.bf16 %v1910_v47, %v1909_v17  ;;  %v2396_v6 = vpop.f32.mrb[131].mxu0 }
 0x2b1   : > { %v1693_v58 = vsel %vm288_vm2, 0.0, %v5477_v54  ;;  %v1695_v59 = vsel %vm288_vm2, 0.0, %v5479_v11 }
 0x2b2   : > { %2229 = vmatmul.mubr.bf16.gmra.mrb[100].mxu1 %v5023_v48  ;;  %2470 = vmatmul.mubr.bf16.gmra.mrb[168].mxu0 %v5023_v48 }
 0x2b3   : > { %3171 = vmatprep.mubr.msk.bf16.mxu1 %vm578_vm1, %v4749_v21  ;;  %3199 = vmatprep.mubr.msk.bf16.mxu0 %vm578_vm1, %v4749_v21 }
 0x2b4   : > { %v3439_v14 = vpop.permute.xlu0 %3438 }
 0x2b5   : > { %v3441_v40 = vunpack.i.h.bf16 %v3439_v14  ;;  %v3440_v7 = vunpack.i.l.bf16 %v3439_v14  ;;  %v5480_v14 = vrot.slane %v4794_v42, 7 }
 0x2b7   : > { %v1911_v30 = vsel %vm578_vm1, %v1693_v58, %v3440_v7  ;;  %v1912_v56 = vsel %vm578_vm1, %v4754_v29, %v3441_v40  ;;  %v5478_v29 = vrot.slane %v4756_v24, 7  ;;  %v1696_v40 = vsel %vm288_vm2, 0.0, %v5480_v14 }
 0x2b8   : > { %v5039_v13 = vpack.c.bf16 %v1912_v56, %v1911_v30  ;;  %v1697_v30 = vsel %vm288_vm2, 0.0, %v1645_v49 }
 0x2b9   : > { %v1694_v32 = vsel %vm288_vm2, 0.0, %v5478_v29 }
 0x2ba   : > { %2237 = vmatmul.mubr.bf16.gmra.mrb[104].mxu1 %v5039_v13  ;;  %2478 = vmatmul.mubr.bf16.gmra.mrb[172].mxu0 %v5039_v13 }
 0x2bb   : > { %3172 = vmatprep.mubr.msk.bf16.mxu1 %vm578_vm1, %v4768_v50  ;;  %3200 = vmatprep.mubr.msk.bf16.mxu0 %vm578_vm1, %v4768_v50 }
 0x2bc   : > { %v3444_v38 = vpop.permute.xlu1 %3443 }
 0x2bd   : > { %v3446_v43 = vunpack.i.h.bf16 %v3444_v38  ;;  %v3445_v0 = vunpack.i.l.bf16 %v3444_v38 }
 0x2bf   : > { %v1913_v52 = vsel %vm578_vm1, %v1694_v32, %v3445_v0  ;;  %v1914_v31 = vsel %vm578_vm1, %v4773_v3, %v3446_v43 }
 0x2c0   : > { %v5055_v51 = vpack.c.bf16 %v1914_v31, %v1913_v52 }
 0x2c2   : > { %2245 = vmatmul.mubr.bf16.gmra.mrb[108].mxu1 %v5055_v51  ;;  %2486 = vmatmul.mubr.bf16.gmra.mrb[176].mxu0 %v5055_v51 }
 0x2c3   : > { %3173 = vmatprep.mubr.msk.bf16.mxu1 %vm578_vm1, %v4787_v55  ;;  %3201 = vmatprep.mubr.msk.bf16.mxu0 %vm578_vm1, %v4787_v55 }
 0x2c4   : > { %v3449_v24 = vpop.permute.xlu0 %3448 }
 0x2c5   : > { %v3451_v4 = vunpack.i.h.bf16 %v3449_v24  ;;  %v3450_v16 = vunpack.i.l.bf16 %v3449_v24 }
 0x2c7   : > { %v1915_v3 = vsel %vm578_vm1, %v1695_v59, %v3450_v16  ;;  %v1916_v9 = vsel %vm578_vm1, %v4792_v15, %v3451_v4 }
 0x2c8   : > { %v5069_v61 = vpack.c.bf16 %v1916_v9, %v1915_v3 }
 0x2ca   : > { %2253 = vmatmul.mubr.bf16.gmra.mrb[112].mxu1 %v5069_v61  ;;  %2494 = vmatmul.mubr.bf16.gmra.mrb[180].mxu0 %v5069_v61 }
 0x2cb   : > { %3174 = vmatprep.mubr.msk.bf16.mxu1 %vm578_vm1, %v4806_v22  ;;  %3202 = vmatprep.mubr.msk.bf16.mxu0 %vm578_vm1, %v4806_v22 }
 0x2cc   : > { %v3454_v35 = vpop.permute.xlu1 %3453 }
 0x2cd   : > { %v3456_v17 = vunpack.i.h.bf16 %v3454_v35  ;;  %v3455_v47 = vunpack.i.l.bf16 %v3454_v35 }
 0x2cf   : > { %v1917_v15 = vsel %vm578_vm1, %v1696_v40, %v3455_v47  ;;  %v1918_v7 = vsel %vm578_vm1, %v4811_v28, %v3456_v17 }
 0x2d0   : > { %v5083_v1 = vpack.c.bf16 %v1918_v7, %v1917_v15 }
 0x2d2   : > { %2261 = vmatmul.mubr.bf16.gmra.mrb[116].mxu1 %v5083_v1  ;;  %2502 = vmatmul.mubr.bf16.gmra.mrb[184].mxu0 %v5083_v1 }
 0x2d3   : > { %3175 = vmatprep.mubr.msk.bf16.mxu1 %vm578_vm1, %v4825_v37  ;;  %3203 = vmatprep.mubr.msk.bf16.mxu0 %vm578_vm1, %v4825_v37 }
 0x2d4   : > { %v3459_v42 = vpop.permute.xlu0 %3458 }
 0x2d5   : > { %v3461_v54 = vunpack.i.h.bf16 %v3459_v42  ;;  %v3460_v58 = vunpack.i.l.bf16 %v3459_v42 }
 0x2d7   : > { %v1919_v28 = vsel %vm578_vm1, %v1697_v30, %v3460_v58  ;;  %v1920_v56 = vsel %vm578_vm1, %v4830_v34, %v3461_v54 }
 0x2d8   : > { %v5097_v38 = vpack.c.bf16 %v1920_v56, %v1919_v28 }
 0x2da   : > { %2269 = vmatmul.mubr.bf16.gmra.mrb[120].mxu1 %v5097_v38  ;;  %2510 = vmatmul.mubr.bf16.gmra.mrb[188].mxu0 %v5097_v38 }
 0x2db   : > { %3176 = vmatprep.mubr.msk.bf16.mxu1 %vm578_vm1, %v4858_v53 }
 0x2dd   : > { %v3464_v6 = vpop.permute.xlu1 %3463 }
 0x2de   : > { %v3466_v43 = vunpack.i.h.bf16 %v3464_v6  ;;  %v3465_v0 = vunpack.i.l.bf16 %v3464_v6 }
 0x2e0   : > { %v1921_v49 = vsel %vm578_vm1, %v1698_v20, %v3465_v0  ;;  %v1922_v34 = vsel %vm578_vm1, %v4852_v36, %v3466_v43 }
 0x2e1   : > { %v5109_v29 = vpack.c.bf16 %v1922_v34, %v1921_v49 }
 0x2e3   : > { %2277 = vmatmul.mubr.bf16.gmra.mrb[124].mxu1 %v5109_v29 }
 0x2e4   : > { %3240 = vmatprep.mubr.msk.bf16.mxu1 %vm578_vm1, %v4578_v57 }
 0x2eb   : > { %2648 = vmatmul.mubr.bf16.vlgmr.msra.gmra.mrb[128].mxu1 %v4871_v2 }
 0x2ec   : > { %3241 = vmatprep.mubr.msk.bf16.mxu1 %vm578_vm1, %v4597_v44 }
 0x2f3   : > { %2656 = vmatmul.mubr.bf16.gmra.mrb[132].mxu1 %v4893_v60 }
 0x2f4   : > { %3242 = vmatprep.mubr.msk.bf16.mxu1 %vm578_vm1, %v4616_v62 }
 0x2fb   : > { %2664 = vmatmul.mubr.bf16.gmra.mrb[136].mxu1 %v4915_v8 }
 0x2fc   : > { %3243 = vmatprep.mubr.msk.bf16.mxu1 %vm578_vm1, %v4635_v19 }
 0x303   : > { %2672 = vmatmul.mubr.bf16.gmra.mrb[140].mxu1 %v4937_v18 }
 0x304   : > { %3244 = vmatprep.mubr.msk.bf16.mxu1 %vm578_vm1, %v4654_v12 }
 0x30b   : > { %2680 = vmatmul.mubr.bf16.gmra.mrb[144].mxu1 %v4959_v10 }
 0x30c   : > { %3245 = vmatprep.mubr.msk.bf16.mxu1 %vm578_vm1, %v4673_v39 }
 0x313   : > { %2688 = vmatmul.mubr.bf16.gmra.mrb[148].mxu1 %v4981_v46 }
 0x314   : > { %3246 = vmatprep.mubr.msk.bf16.mxu1 %vm578_vm1, %v4692_v26 }
 0x31b   : > { %2696 = vmatmul.mubr.bf16.gmra.mrb[152].mxu1 %v4995_v27 }
 0x31c   : > { %3247 = vmatprep.mubr.msk.bf16.mxu1 %vm578_vm1, %v4711_v5 }
 0x323   : > { %2704 = vmatmul.mubr.bf16.gmra.mrb[156].mxu1 %v5009_v41 }
 0x324   : > { %3248 = vmatprep.mubr.msk.bf16.mxu1 %vm578_vm1, %v4730_v63 }
 0x32b   : > { %2712 = vmatmul.mubr.bf16.gmra.mrb[160].mxu1 %v5023_v48 }
 0x32c   : > { %3249 = vmatprep.mubr.msk.bf16.mxu1 %vm578_vm1, %v4749_v21 }
 0x333   : > { %2720 = vmatmul.mubr.bf16.gmra.mrb[164].mxu1 %v5039_v13 }
 0x334   : > { %3250 = vmatprep.mubr.msk.bf16.mxu1 %vm578_vm1, %v4768_v50 }
 0x33b   : > { %2728 = vmatmul.mubr.bf16.gmra.mrb[168].mxu1 %v5055_v51 }
 0x33c   : > { %3251 = vmatprep.mubr.msk.bf16.mxu1 %vm578_vm1, %v4787_v55 }
 0x33d   : > { %v2158_v5 = vpop.f32.mrb[64].mxu1  ;;  %v2399_v57 = vpop.f32.mrb[132].mxu0 }
 0x33e   : > { %v5148_v44 = vadd.f32 %v5031_v33, %v2158_v5  ;;  %v2160_v62 = vpop.f32.mrb[65].mxu1  ;;  %v2401_v19 = vpop.f32.mrb[133].mxu0 }
 0x33f   : > { %v2161_v12 = vpop.f32.mrb[66].mxu1  ;;  %v2402_v39 = vpop.f32.mrb[134].mxu0 }
 0x340   : > { %v5151_v21 = vadd.f32 %v5047_v45, %v2161_v12  ;;  %v2163_v63 = vpop.f32.mrb[67].mxu1  ;;  %v2404_v26 = vpop.f32.mrb[135].mxu0 }
 0x343   : > { %2736 = vmatmul.mubr.bf16.gmra.mrb[172].mxu1 %v5069_v61  ;;  %v5481_v61 = vmov 0.0|0.0  }
 0x344   : > { %3252 = vmatprep.mubr.msk.bf16.mxu1 %vm578_vm1, %v4806_v22 }
 0x345   : > { %v2166_v55 = vpop.f32.mrb[68].mxu1  ;;  %v2407_v50 = vpop.f32.mrb[136].mxu0 }
 0x346   : > { %v5156_v23 = vadd.f32 %v2399_v57, %v2166_v55  ;;  %v2168_v25 = vpop.f32.mrb[69].mxu1  ;;  %v2409_v36 = vpop.f32.mrb[137].mxu0 }
 0x347   : > { %v2169_v2 = vpop.f32.mrb[70].mxu1  ;;  %v2410_v60 = vpop.f32.mrb[138].mxu0 }
 0x348   : > { %v5158_v8 = vadd.f32 %v2402_v39, %v2169_v2  ;;  %v2171_v18 = vpop.f32.mrb[71].mxu1  ;;  %v2412_v10 = vpop.f32.mrb[139].mxu0 }
 0x34b   : > { %2744 = vmatmul.mubr.bf16.gmra.mrb[176].mxu1 %v5083_v1 }
 0x34c   : > { %3253 = vmatprep.mubr.msk.bf16.mxu1 %vm578_vm1, %v4825_v37 }
 0x34d   : > { %v2174_v46 = vpop.f32.mrb[72].mxu1  ;;  %v2415_v27 = vpop.f32.mrb[140].mxu0 }
 0x34e   : > { %v5163_v22 = vadd.f32 %v2407_v50, %v2174_v46  ;;  %v2176_v41 = vpop.f32.mrb[73].mxu1  ;;  %v2417_v48 = vpop.f32.mrb[141].mxu0 }
 0x34f   : > { %v2177_v33 = vpop.f32.mrb[74].mxu1  ;;  %v2418_v13 = vpop.f32.mrb[142].mxu0 }
 0x350   : > { %v5165_v45 = vadd.f32 %v2410_v60, %v2177_v33  ;;  %v2179_v32 = vpop.f32.mrb[75].mxu1  ;;  %v2420_v52 = vpop.f32.mrb[143].mxu0 }
 0x353   : > { %2752 = vmatmul.mubr.bf16.gmra.mrb[180].mxu1 %v5097_v38 }
 0x354   : > { %3254 = vmatprep.mubr.msk.bf16.mxu1 %vm578_vm1, %v4858_v53 }
 0x355   : > { %v2182_v31 = vpop.f32.mrb[76].mxu1  ;;  %v2423_v51 = vpop.f32.mrb[144].mxu0 }
 0x356   : > { %v5170_v37 = vadd.f32 %v2415_v27, %v2182_v31  ;;  %v2184_v24 = vpop.f32.mrb[77].mxu1  ;;  %v2425_v4 = vpop.f32.mrb[145].mxu0 }
 0x357   : > { %v2185_v16 = vpop.f32.mrb[78].mxu1  ;;  %v2426_v11 = vpop.f32.mrb[146].mxu0 }
 0x358   : > { %v5172_v59 = vadd.f32 %v2418_v13, %v2185_v16  ;;  %v2187_v3 = vpop.f32.mrb[79].mxu1  ;;  %v2428_v9 = vpop.f32.mrb[147].mxu0 }
 0x35b   : > { %2760 = vmatmul.mubr.bf16.gmra.mrb[184].mxu1 %v5109_v29 }
 0x35c   : > { %2767 = vmatprep.mubr.bf16.mxu1 %v5481_v61 }
 0x35d   : > { %v2190_v35 = vpop.f32.mrb[80].mxu1  ;;  %v2431_v17 = vpop.f32.mrb[148].mxu0 }
 0x35e   : > { %v5176_v47 = vadd.f32 %v2423_v51, %v2190_v35  ;;  %v2192_v53 = vpop.f32.mrb[81].mxu1  ;;  %v2433_v14 = vpop.f32.mrb[149].mxu0 }
 0x35f   : > { %v2193_v40 = vpop.f32.mrb[82].mxu1  ;;  %v2434_v15 = vpop.f32.mrb[150].mxu0 }
 0x360   : > { %v5178_v7 = vadd.f32 %v2426_v11, %v2193_v40  ;;  %v2195_v1 = vpop.f32.mrb[83].mxu1  ;;  %v2436_v42 = vpop.f32.mrb[151].mxu0 }
 0x363   : > { %2768 = vmatmul.mubr.bf16.gmra.mrb[188].mxu1 %v5481_v61 }
 0x365   : > { %v2198_v54 = vpop.f32.mrb[84].mxu1  ;;  %v2439_v58 = vpop.f32.mrb[152].mxu0 }
 0x366   : > { %v5181_v30 = vadd.f32 %v2431_v17, %v2198_v54  ;;  %v2200_v28 = vpop.f32.mrb[85].mxu1  ;;  %v2441_v56 = vpop.f32.mrb[153].mxu0 }
 0x367   : > { %v2201_v38 = vpop.f32.mrb[86].mxu1  ;;  %v2442_v6 = vpop.f32.mrb[154].mxu0 }
 0x368   : > { %v5183_v43 = vadd.f32 %v2434_v15, %v2201_v38  ;;  %v2203_v0 = vpop.f32.mrb[87].mxu1  ;;  %v2444_v20 = vpop.f32.mrb[155].mxu0 }
 0x36d   : > { %v2206_v49 = vpop.f32.mrb[88].mxu1  ;;  %v2447_v34 = vpop.f32.mrb[156].mxu0 }
 0x36e   : > { %v5185_v29 = vadd.f32 %v2439_v58, %v2206_v49  ;;  %v2208_v5 = vpop.f32.mrb[89].mxu1  ;;  %v2449_v57 = vpop.f32.mrb[157].mxu0 }
 0x36f   : > { %v2209_v62 = vpop.f32.mrb[90].mxu1  ;;  %v2450_v19 = vpop.f32.mrb[158].mxu0 }
 0x370   : > { %v5187_v12 = vadd.f32 %v2442_v6, %v2209_v62  ;;  %v2211_v39 = vpop.f32.mrb[91].mxu1  ;;  %v2452_v63 = vpop.f32.mrb[159].mxu0 }
 0x375   : > { %v2214_v26 = vpop.f32.mrb[92].mxu1  ;;  %v2455_v55 = vpop.f32.mrb[160].mxu0 }
 0x376   : > { %v5189_v50 = vadd.f32 %v2447_v34, %v2214_v26  ;;  %v2216_v25 = vpop.f32.mrb[93].mxu1  ;;  %v2457_v36 = vpop.f32.mrb[161].mxu0 }
 0x377   : > { %v2217_v2 = vpop.f32.mrb[94].mxu1  ;;  %v2458_v60 = vpop.f32.mrb[162].mxu0 }
 0x378   : > { %v5191_v18 = vadd.f32 %v2450_v19, %v2217_v2  ;;  %v2219_v10 = vpop.f32.mrb[95].mxu1  ;;  %v2460_v46 = vpop.f32.mrb[163].mxu0 }
 0x37d   : > { %v2222_v27 = vpop.f32.mrb[96].mxu1  ;;  %v2463_v41 = vpop.f32.mrb[164].mxu0 }
 0x37e   : > { %v5193_v48 = vadd.f32 %v2455_v55, %v2222_v27  ;;  %v2224_v33 = vpop.f32.mrb[97].mxu1  ;;  %v2465_v13 = vpop.f32.mrb[165].mxu0 }
 0x37f   : > { %v2225_v32 = vpop.f32.mrb[98].mxu1  ;;  %v2466_v52 = vpop.f32.mrb[166].mxu0 }
 0x380   : > { %v5195_v31 = vadd.f32 %v2458_v60, %v2225_v32  ;;  %v2227_v51 = vpop.f32.mrb[99].mxu1  ;;  %v2468_v24 = vpop.f32.mrb[167].mxu0 }
 0x385   : > { %v2230_v4 = vpop.f32.mrb[100].mxu1  ;;  %v2471_v16 = vpop.f32.mrb[168].mxu0 }
 0x386   : > { %v5197_v11 = vadd.f32 %v2463_v41, %v2230_v4  ;;  %v2232_v3 = vpop.f32.mrb[101].mxu1  ;;  %v2473_v9 = vpop.f32.mrb[169].mxu0 }
 0x387   : > { %v2233_v61 = vpop.f32.mrb[102].mxu1  ;;  %v2474_v35 = vpop.f32.mrb[170].mxu0 }
 0x388   : > { %v5199_v17 = vadd.f32 %v2466_v52, %v2233_v61  ;;  %v2235_v53 = vpop.f32.mrb[103].mxu1  ;;  %v2476_v14 = vpop.f32.mrb[171].mxu0 }
 0x38d   : > { %v2238_v40 = vpop.f32.mrb[104].mxu1  ;;  %v2479_v15 = vpop.f32.mrb[172].mxu0 }
 0x38e   : > { %v5201_v1 = vadd.f32 %v2471_v16, %v2238_v40  ;;  %v2240_v42 = vpop.f32.mrb[105].mxu1  ;;  %v2481_v54 = vpop.f32.mrb[173].mxu0 }
 0x38f   : > { %v2241_v58 = vpop.f32.mrb[106].mxu1  ;;  %v2482_v28 = vpop.f32.mrb[174].mxu0 }
 0x390   : > { %v5203_v56 = vadd.f32 %v2474_v35, %v2241_v58  ;;  %v2243_v38 = vpop.f32.mrb[107].mxu1  ;;  %v2484_v6 = vpop.f32.mrb[175].mxu0 }
 0x395   : > { %v2246_v0 = vpop.f32.mrb[108].mxu1  ;;  %v2487_v20 = vpop.f32.mrb[176].mxu0 }
 0x396   : > { %v5205_v49 = vadd.f32 %v2479_v15, %v2246_v0  ;;  %v2248_v34 = vpop.f32.mrb[109].mxu1  ;;  %v2489_v5 = vpop.f32.mrb[177].mxu0 }
 0x397   : > { %v2249_v57 = vpop.f32.mrb[110].mxu1  ;;  %v2490_v62 = vpop.f32.mrb[178].mxu0 }
 0x398   : > { %v5207_v19 = vadd.f32 %v2482_v28, %v2249_v57  ;;  %v2251_v39 = vpop.f32.mrb[111].mxu1  ;;  %v2492_v63 = vpop.f32.mrb[179].mxu0 }
 0x39d   : > { %v2254_v26 = vpop.f32.mrb[112].mxu1  ;;  %v2495_v55 = vpop.f32.mrb[180].mxu0 }
 0x39e   : > { %v5209_v25 = vadd.f32 %v2487_v20, %v2254_v26  ;;  %v2256_v36 = vpop.f32.mrb[113].mxu1  ;;  %v2497_v2 = vpop.f32.mrb[181].mxu0 }
 0x39f   : > { %v2257_v60 = vpop.f32.mrb[114].mxu1  ;;  %v2498_v10 = vpop.f32.mrb[182].mxu0 }
 0x3a0   : > { %v5211_v46 = vadd.f32 %v2490_v62, %v2257_v60  ;;  %v2259_v27 = vpop.f32.mrb[115].mxu1  ;;  %v2500_v41 = vpop.f32.mrb[183].mxu0  ;;  %v5229_v62 = vld [vmem:[%s5451_s4] ss:$0 sm:$0xff] }
 0x3a1   : > { %v3539_v60 = vld [vmem:[%s3740_s17] sm:$0xff] }
 0x3a5   : > { %v2262_v33 = vpop.f32.mrb[116].mxu1  ;;  %v2503_v13 = vpop.f32.mrb[184].mxu0 }
 0x3a6   : > { %v5213_v32 = vadd.f32 %v2495_v55, %v2262_v33  ;;  %v2264_v52 = vpop.f32.mrb[117].mxu1  ;;  %v2505_v51 = vpop.f32.mrb[185].mxu0 }
 0x3a7   : > { %v2265_v24 = vpop.f32.mrb[118].mxu1  ;;  %v2506_v4 = vpop.f32.mrb[186].mxu0 }
 0x3a8   : > { %v5215_v16 = vadd.f32 %v2498_v10, %v2265_v24  ;;  %v2267_v3 = vpop.f32.mrb[119].mxu1  ;;  %v2508_v9 = vpop.f32.mrb[187].mxu0 }
 0x3a9   : > { %v3541_v3 = vld [vmem:[%s3740_s17 + $0x10] sm:$0xff] }
 0x3ad   : > { %v2270_v61 = vpop.f32.mrb[120].mxu1  ;;  %v2511_v35 = vpop.f32.mrb[188].mxu0 }
 0x3ae   : > { %v5217_v53 = vadd.f32 %v2503_v13, %v2270_v61  ;;  %v2272_v14 = vpop.f32.mrb[121].mxu1  ;;  %v2513_v40 = vpop.f32.mrb[189].mxu0 }
 0x3af   : > { %v2273_v15 = vpop.f32.mrb[122].mxu1  ;;  %v2514_v42 = vpop.f32.mrb[190].mxu0 }
 0x3b0   : > { %v5219_v54 = vadd.f32 %v2506_v4, %v2273_v15  ;;  %v2275_v58 = vpop.f32.mrb[123].mxu1  ;;  %v2516_v28 = vpop.f32.mrb[191].mxu0 }
 0x3b6   : > { %v2278_v38 = vpop.f32.mrb[124].mxu1 }
 0x3b7   : > { %v5221_v6 = vadd.f32 %v2511_v35, %v2278_v38  ;;  %v2280_v0 = vpop.f32.mrb[125].mxu1  ;;  %v3542_v35 = vld [vmem:[%s3740_s17 + $0x18] sm:$0xff]  ;;  %v3543_v38 = vld [vmem:[%s3740_s17 + $0x20] sm:$0xff] }
 0x3b8   : > { %v2281_v20 = vpop.f32.mrb[126].mxu1 }
 0x3b9   : > { %v5223_v34 = vadd.f32 %v2514_v42, %v2281_v20  ;;  %v2283_v5 = vpop.f32.mrb[127].mxu1 }
 0x3ba   : > { %v3544_v5 = vld [vmem:[%s3740_s17 + $0x28] sm:$0xff] }
 0x3be   : > { %v2649_v57 = vpop.f32.mrb[128].mxu1 }
 0x3bf   : > { %v2776_v39 = vadd.f32 %v2649_v57, %v5148_v44  ;;  %v2651_v63 = vpop.f32.mrb[129].mxu1  ;;  %v3540_v44 = vld [vmem:[%s3740_s17 + $0x8] sm:$0xff] }
 0x3c0   : > { %v2652_v26 = vpop.f32.mrb[130].mxu1 }
 0x3c1   : > { %v2815_v55 = vadd.f32 %v5229_v62, %v2776_v39  ;;  %v2777_v36 = vadd.f32 %v2652_v26, %v5151_v21  ;;  %v2654_v2 = vpop.f32.mrb[131].mxu1 }
 0x3c2   : > { %v3545_v2 = vld [vmem:[%s3740_s17 + $0x30] sm:$0xff] }
 0x3c3   : > { %v2847_v10 = vadd.f32 %v3539_v60, %v2815_v55  ;;  %v2816_v27 = vadd.f32 %v5229_v62, %v2777_v36 }
 0x3c5   : > { %2879 = vst.msk [vmem:[%s5238_s23] sm:$0xff] %vm578_vm1, %v2847_v10  ;;  %v2848_v41 = vadd.f32 %v3540_v44, %v2816_v27  ;;  %v3546_v27 = vld [vmem:[%s3740_s17 + $0x38] sm:$0xff] }
 0x3c6   : > { %v2657_v33 = vpop.f32.mrb[132].mxu1 }
 0x3c7   : > { %2880 = vst.msk [vmem:[%s5238_s23 + $0x8] sm:$0xff] %vm578_vm1, %v2848_v41  ;;  %v2778_v21 = vadd.f32 %v2657_v33, %v5156_v23  ;;  %v2659_v13 = vpop.f32.mrb[133].mxu1 }
 0x3c8   : > { %v2660_v52 = vpop.f32.mrb[134].mxu1 }
 0x3c9   : > { %v2817_v51 = vadd.f32 %v5229_v62, %v2778_v21  ;;  %v2779_v24 = vadd.f32 %v2660_v52, %v5158_v8  ;;  %v2662_v4 = vpop.f32.mrb[135].mxu1 }
 0x3cb   : > { %v2849_v9 = vadd.f32 %v3541_v3, %v2817_v51  ;;  %v2818_v61 = vadd.f32 %v5229_v62, %v2779_v24  ;;  %v3547_v51 = vld [vmem:[%s3740_s17 + $0x40] sm:$0xff]  ;;  %v3548_v3 = vld [vmem:[%s3740_s17 + $0x48] sm:$0xff] }
 0x3cd   : > { %2881 = vst.msk [vmem:[%s5238_s23 + $0x10] sm:$0xff] %vm578_vm1, %v2849_v9  ;;  %v2850_v14 = vadd.f32 %v3542_v35, %v2818_v61 }
 0x3ce   : > { %v2665_v23 = vpop.f32.mrb[136].mxu1 }
 0x3cf   : > { %2882 = vst.msk [vmem:[%s5238_s23 + $0x18] sm:$0xff] %vm578_vm1, %v2850_v14  ;;  %v2780_v40 = vadd.f32 %v2665_v23, %v5163_v22  ;;  %v2667_v15 = vpop.f32.mrb[137].mxu1 }
 0x3d0   : > { %v2668_v8 = vpop.f32.mrb[138].mxu1  ;;  %v3549_v15 = vld [vmem:[%s3740_s17 + $0x50] sm:$0xff] }
 0x3d1   : > { %v2819_v42 = vadd.f32 %v5229_v62, %v2780_v40  ;;  %v2781_v58 = vadd.f32 %v2668_v8, %v5165_v45  ;;  %v2670_v28 = vpop.f32.mrb[139].mxu1 }
 0x3d3   : > { %v2851_v0 = vadd.f32 %v3543_v38, %v2819_v42  ;;  %v2820_v20 = vadd.f32 %v5229_v62, %v2781_v58  ;;  %v3550_v58 = vld [vmem:[%s3740_s17 + $0x58] sm:$0xff] }
 0x3d5   : > { %2883 = vst.msk [vmem:[%s5238_s23 + $0x20] sm:$0xff] %vm578_vm1, %v2851_v0  ;;  %v2852_v57 = vadd.f32 %v3544_v5, %v2820_v20 }
 0x3d6   : > { %v2673_v22 = vpop.f32.mrb[140].mxu1 }
 0x3d7   : > { %2884 = vst.msk [vmem:[%s5238_s23 + $0x28] sm:$0xff] %vm578_vm1, %v2852_v57  ;;  %v2782_v39 = vadd.f32 %v2673_v22, %v5170_v37  ;;  %v2675_v63 = vpop.f32.mrb[141].mxu1  ;;  %v3551_v22 = vld [vmem:[%s3740_s17 + $0x60] sm:$0xff] }
 0x3d8   : > { %v2676_v45 = vpop.f32.mrb[142].mxu1 }
 0x3d9   : > { %v2821_v26 = vadd.f32 %v5229_v62, %v2782_v39  ;;  %v2783_v55 = vadd.f32 %v2676_v45, %v5172_v59  ;;  %v2678_v36 = vpop.f32.mrb[143].mxu1  ;;  %v3552_v45 = vld [vmem:[%s3740_s17 + $0x68] sm:$0xff] }
 0x3db   : > { %v2853_v60 = vadd.f32 %v3545_v2, %v2821_v26  ;;  %v2822_v10 = vadd.f32 %v5229_v62, %v2783_v55 }
 0x3dd   : > { %2885 = vst.msk [vmem:[%s5238_s23 + $0x30] sm:$0xff] %vm578_vm1, %v2853_v60  ;;  %v2854_v44 = vadd.f32 %v3546_v27, %v2822_v10  ;;  %v3553_v27 = vld [vmem:[%s3740_s17 + $0x70] sm:$0xff] }
 0x3de   : > { %v2681_v37 = vpop.f32.mrb[144].mxu1 }
 0x3df   : > { %2886 = vst.msk [vmem:[%s5238_s23 + $0x38] sm:$0xff] %vm578_vm1, %v2854_v44  ;;  %v2784_v41 = vadd.f32 %v2681_v37, %v5176_v47  ;;  %v2683_v33 = vpop.f32.mrb[145].mxu1 }
 0x3e0   : > { %v2684_v59 = vpop.f32.mrb[146].mxu1 }
 0x3e1   : > { %v2823_v21 = vadd.f32 %v5229_v62, %v2784_v41  ;;  %v2785_v13 = vadd.f32 %v2684_v59, %v5178_v7  ;;  %v2686_v52 = vpop.f32.mrb[147].mxu1  ;;  %v3554_v41 = vld [vmem:[%s3740_s17 + $0x78] sm:$0xff] }
 0x3e3   : > { %v2855_v24 = vadd.f32 %v3547_v51, %v2823_v21  ;;  %v2824_v4 = vadd.f32 %v5229_v62, %v2785_v13 }
 0x3e5   : > { %2887 = vst.msk [vmem:[%s5238_s23 + $0x40] sm:$0xff] %vm578_vm1, %v2855_v24  ;;  %v2856_v9 = vadd.f32 %v3548_v3, %v2824_v4  ;;  %v3555_v24 = vld [vmem:[%s3740_s17 + $0x80] sm:$0xff] }
 0x3e6   : > { %v2689_v47 = vpop.f32.mrb[148].mxu1 }
 0x3e7   : > { %2888 = vst.msk [vmem:[%s5238_s23 + $0x48] sm:$0xff] %vm578_vm1, %v2856_v9  ;;  %v2786_v61 = vadd.f32 %v2689_v47, %v5181_v30  ;;  %v2691_v35 = vpop.f32.mrb[149].mxu1  ;;  %v3556_v9 = vld [vmem:[%s3740_s17 + $0x88] sm:$0xff] }
 0x3e8   : > { %v2692_v7 = vpop.f32.mrb[150].mxu1 }
 0x3e9   : > { %v2825_v14 = vadd.f32 %v5229_v62, %v2786_v61  ;;  %v2787_v23 = vadd.f32 %v2692_v7, %v5183_v43  ;;  %v2694_v40 = vpop.f32.mrb[151].mxu1 }
 0x3ea   : > { %v3557_v40 = vld [vmem:[%s3740_s17 + $0x90] sm:$0xff] }
 0x3eb   : > { %v2857_v8 = vadd.f32 %v3549_v15, %v2825_v14  ;;  %v2826_v42 = vadd.f32 %v5229_v62, %v2787_v23 }
 0x3ed   : > { %2889 = vst.msk [vmem:[%s5238_s23 + $0x50] sm:$0xff] %vm578_vm1, %v2857_v8  ;;  %v2858_v28 = vadd.f32 %v3550_v58, %v2826_v42  ;;  %v3558_v42 = vld [vmem:[%s3740_s17 + $0x98] sm:$0xff] }
 0x3ee   : > { %v2697_v30 = vpop.f32.mrb[152].mxu1 }
 0x3ef   : > { %2890 = vst.msk [vmem:[%s5238_s23 + $0x58] sm:$0xff] %vm578_vm1, %v2858_v28  ;;  %v2788_v38 = vadd.f32 %v2697_v30, %v5185_v29  ;;  %v2699_v0 = vpop.f32.mrb[153].mxu1 }
 0x3f0   : > { %v2700_v43 = vpop.f32.mrb[154].mxu1 }
 0x3f1   : > { %v2827_v20 = vadd.f32 %v5229_v62, %v2788_v38  ;;  %v2789_v5 = vadd.f32 %v2700_v43, %v5187_v12  ;;  %v2702_v57 = vpop.f32.mrb[155].mxu1 }
 0x3f3   : > { %v2859_v39 = vadd.f32 %v3551_v22, %v2827_v20  ;;  %v2828_v63 = vadd.f32 %v5229_v62, %v2789_v5  ;;  %v3559_v20 = vld [vmem:[%s3740_s17 + $0xa0] sm:$0xff]  ;;  %v3560_v22 = vld [vmem:[%s3740_s17 + $0xa8] sm:$0xff] }
 0x3f5   : > { %2891 = vst.msk [vmem:[%s5238_s23 + $0x60] sm:$0xff] %vm578_vm1, %v2859_v39  ;;  %v2860_v26 = vadd.f32 %v3552_v45, %v2828_v63 }
 0x3f6   : > { %v2705_v29 = vpop.f32.mrb[156].mxu1 }
 0x3f7   : > { %2892 = vst.msk [vmem:[%s5238_s23 + $0x68] sm:$0xff] %vm578_vm1, %v2860_v26  ;;  %v2790_v55 = vadd.f32 %v2705_v29, %v5189_v50  ;;  %v2707_v36 = vpop.f32.mrb[157].mxu1 }
 0x3f8   : > { %v2708_v12 = vpop.f32.mrb[158].mxu1  ;;  %v3561_v36 = vld [vmem:[%s3740_s17 + $0xb0] sm:$0xff] }
 0x3f9   : > { %v2829_v2 = vadd.f32 %v5229_v62, %v2790_v55  ;;  %v2791_v60 = vadd.f32 %v2708_v12, %v5191_v18  ;;  %v2710_v10 = vpop.f32.mrb[159].mxu1 }
 0x3fb   : > { %v2861_v44 = vadd.f32 %v3553_v27, %v2829_v2  ;;  %v2830_v37 = vadd.f32 %v5229_v62, %v2791_v60  ;;  %v3562_v60 = vld [vmem:[%s3740_s17 + $0xb8] sm:$0xff] }
 0x3fd   : > { %2893 = vst.msk [vmem:[%s5238_s23 + $0x70] sm:$0xff] %vm578_vm1, %v2861_v44  ;;  %v2862_v33 = vadd.f32 %v3554_v41, %v2830_v37 }
 0x3fe   : > { %v2713_v50 = vpop.f32.mrb[160].mxu1 }
 0x3ff   : > { %2894 = vst.msk [vmem:[%s5238_s23 + $0x78] sm:$0xff] %vm578_vm1, %v2862_v33  ;;  %v2792_v59 = vadd.f32 %v2713_v50, %v5193_v48  ;;  %v2715_v21 = vpop.f32.mrb[161].mxu1  ;;  %v3563_v50 = vld [vmem:[%s3740_s17 + $0xc0] sm:$0xff] }
 0x400   : > { %v2716_v18 = vpop.f32.mrb[162].mxu1 }
 0x401   : > { %v2831_v13 = vadd.f32 %v5229_v62, %v2792_v59  ;;  %v2793_v52 = vadd.f32 %v2716_v18, %v5195_v31  ;;  %v2718_v51 = vpop.f32.mrb[163].mxu1  ;;  %v3564_v18 = vld [vmem:[%s3740_s17 + $0xc8] sm:$0xff] }
 0x403   : > { %v2863_v4 = vadd.f32 %v3555_v24, %v2831_v13  ;;  %v2832_v3 = vadd.f32 %v5229_v62, %v2793_v52 }
 0x405   : > { %2895 = vst.msk [vmem:[%s5238_s23 + $0x80] sm:$0xff] %vm578_vm1, %v2863_v4  ;;  %v2864_v47 = vadd.f32 %v3556_v9, %v2832_v3  ;;  %v3565_v9 = vld [vmem:[%s3740_s17 + $0xd0] sm:$0xff] }
 0x406   : > { %v2721_v48 = vpop.f32.mrb[164].mxu1 }
 0x407   : > { %2896 = vst.msk [vmem:[%s5238_s23 + $0x88] sm:$0xff] %vm578_vm1, %v2864_v47  ;;  %v2794_v61 = vadd.f32 %v2721_v48, %v5197_v11  ;;  %v2723_v35 = vpop.f32.mrb[165].mxu1 }
 0x408   : > { %v2724_v31 = vpop.f32.mrb[166].mxu1 }
 0x409   : > { %v2833_v7 = vadd.f32 %v5229_v62, %v2794_v61  ;;  %v2795_v14 = vadd.f32 %v2724_v31, %v5199_v17  ;;  %v2726_v23 = vpop.f32.mrb[167].mxu1  ;;  %v3566_v61 = vld [vmem:[%s3740_s17 + $0xd8] sm:$0xff] }
 0x40b   : > { %v2865_v15 = vadd.f32 %v3557_v40, %v2833_v7  ;;  %v2834_v8 = vadd.f32 %v5229_v62, %v2795_v14 }
 0x40d   : > { %2897 = vst.msk [vmem:[%s5238_s23 + $0x90] sm:$0xff] %vm578_vm1, %v2865_v15  ;;  %v2866_v58 = vadd.f32 %v3558_v42, %v2834_v8  ;;  %v3567_v15 = vld [vmem:[%s3740_s17 + $0xe0] sm:$0xff] }
 0x40e   : > { %v2729_v11 = vpop.f32.mrb[168].mxu1 }
 0x40f   : > { %2898 = vst.msk [vmem:[%s5238_s23 + $0x98] sm:$0xff] %vm578_vm1, %v2866_v58  ;;  %v2796_v28 = vadd.f32 %v2729_v11, %v5201_v1  ;;  %v2731_v30 = vpop.f32.mrb[169].mxu1  ;;  %v3568_v58 = vld [vmem:[%s3740_s17 + $0xe8] sm:$0xff] }
 0x410   : > { %v2732_v17 = vpop.f32.mrb[170].mxu1 }
 0x411   : > { %v2835_v38 = vadd.f32 %v5229_v62, %v2796_v28  ;;  %v2797_v0 = vadd.f32 %v2732_v17, %v5203_v56  ;;  %v2734_v43 = vpop.f32.mrb[171].mxu1 }
 0x412   : > { %v3569_v43 = vld [vmem:[%s3740_s17 + $0xf0] sm:$0xff] }
 0x413   : > { %v2867_v5 = vadd.f32 %v3559_v20, %v2835_v38  ;;  %v2836_v57 = vadd.f32 %v5229_v62, %v2797_v0 }
 0x415   : > { %2899 = vst.msk [vmem:[%s5238_s23 + $0xa0] sm:$0xff] %vm578_vm1, %v2867_v5  ;;  %v2868_v39 = vadd.f32 %v3560_v22, %v2836_v57 }
 0x416   : > { %v2737_v1 = vpop.f32.mrb[172].mxu1 }
 0x417   : > { %2900 = vst.msk [vmem:[%s5238_s23 + $0xa8] sm:$0xff] %vm578_vm1, %v2868_v39  ;;  %v2798_v63 = vadd.f32 %v2737_v1, %v5205_v49  ;;  %v2739_v45 = vpop.f32.mrb[173].mxu1 }
 0x418   : > { %v2740_v56 = vpop.f32.mrb[174].mxu1 }
 0x419   : > { %v2837_v26 = vadd.f32 %v5229_v62, %v2798_v63  ;;  %v2799_v29 = vadd.f32 %v2740_v56, %v5207_v19  ;;  %v2742_v55 = vpop.f32.mrb[175].mxu1 }
 0x41b   : > { %v2869_v12 = vadd.f32 %v3561_v36, %v2837_v26  ;;  %v2838_v2 = vadd.f32 %v5229_v62, %v2799_v29 }
 0x41d   : > { %2901 = vst.msk [vmem:[%s5238_s23 + $0xb0] sm:$0xff] %vm578_vm1, %v2869_v12  ;;  %v2870_v10 = vadd.f32 %v3562_v60, %v2838_v2 }
 0x41e   : > { %v2745_v49 = vpop.f32.mrb[176].mxu1 }
 0x41f   : > { %2902 = vst.msk [vmem:[%s5238_s23 + $0xb8] sm:$0xff] %vm578_vm1, %v2870_v10  ;;  %v2800_v27 = vadd.f32 %v2745_v49, %v5209_v25  ;;  %v2747_v44 = vpop.f32.mrb[177].mxu1 }
 0x420   : > { %v2748_v19 = vpop.f32.mrb[178].mxu1 }
 0x421   : > { %v2839_v37 = vadd.f32 %v5229_v62, %v2800_v27  ;;  %v2801_v41 = vadd.f32 %v2748_v19, %v5211_v46  ;;  %v2750_v33 = vpop.f32.mrb[179].mxu1 }
 0x423   : > { %v2871_v59 = vadd.f32 %v3563_v50, %v2839_v37  ;;  %v2840_v21 = vadd.f32 %v5229_v62, %v2801_v41 }
 0x425   : > { %2903 = vst.msk [vmem:[%s5238_s23 + $0xc0] sm:$0xff] %vm578_vm1, %v2871_v59  ;;  %v2872_v13 = vadd.f32 %v3564_v18, %v2840_v21 }
 0x426   : > { %v2753_v25 = vpop.f32.mrb[180].mxu1 }
 0x427   : > { %2904 = vst.msk [vmem:[%s5238_s23 + $0xc8] sm:$0xff] %vm578_vm1, %v2872_v13  ;;  %v2802_v52 = vadd.f32 %v2753_v25, %v5213_v32  ;;  %v2755_v51 = vpop.f32.mrb[181].mxu1 }
 0x428   : > { %v2756_v46 = vpop.f32.mrb[182].mxu1 }
 0x429   : > { %v2841_v24 = vadd.f32 %v5229_v62, %v2802_v52  ;;  %v2803_v4 = vadd.f32 %v2756_v46, %v5215_v16  ;;  %v2758_v3 = vpop.f32.mrb[183].mxu1 }
 0x42b   : > { %v2873_v47 = vadd.f32 %v3565_v9, %v2841_v24  ;;  %v2842_v48 = vadd.f32 %v5229_v62, %v2803_v4 }
 0x42d   : > { %2905 = vst.msk [vmem:[%s5238_s23 + $0xd0] sm:$0xff] %vm578_vm1, %v2873_v47  ;;  %v2874_v35 = vadd.f32 %v3566_v61, %v2842_v48 }
 0x42e   : > { %v2761_v32 = vpop.f32.mrb[184].mxu1 }
 0x42f   : > { %2906 = vst.msk [vmem:[%s5238_s23 + $0xd8] sm:$0xff] %vm578_vm1, %v2874_v35  ;;  %v2804_v31 = vadd.f32 %v2761_v32, %v5217_v53  ;;  %v2763_v7 = vpop.f32.mrb[185].mxu1 }
 0x430   : > { %v2764_v16 = vpop.f32.mrb[186].mxu1 }
 0x431   : > { %v2843_v14 = vadd.f32 %v5229_v62, %v2804_v31  ;;  %v2805_v23 = vadd.f32 %v2764_v16, %v5219_v54  ;;  %v2766_v40 = vpop.f32.mrb[187].mxu1 }
 0x433   : > { %v2875_v8 = vadd.f32 %v3567_v15, %v2843_v14  ;;  %v2844_v42 = vadd.f32 %v5229_v62, %v2805_v23 }
 0x435   : > { %2907 = vst.msk [vmem:[%s5238_s23 + $0xe0] sm:$0xff] %vm578_vm1, %v2875_v8  ;;  %v2876_v11 = vadd.f32 %v3568_v58, %v2844_v42 }
 0x436   : > { %v2769_v53 = vpop.f32.mrb[188].mxu1 }
 0x437   : > { %2908 = vst.msk [vmem:[%s5238_s23 + $0xe8] sm:$0xff] %vm578_vm1, %v2876_v11  ;;  %v2806_v28 = vadd.f32 %v2769_v53, %v5221_v6  ;;  %v2771_v54 = vpop.f32.mrb[189].mxu1  ;;  %v3570_v6 = vld [vmem:[%s3740_s17 + $0xf8] sm:$0xff] }
 0x438   : > { %v2772_v30 = vpop.f32.mrb[190].mxu1 }
 0x439   : > { %v2845_v17 = vadd.f32 %v5229_v62, %v2806_v28  ;;  %v2807_v38 = vadd.f32 %v2772_v30, %v5223_v34  ;;  %v2774_v0 = vpop.f32.mrb[191].mxu1 }
 0x43b   : > { %v2877_v20 = vadd.f32 %v3569_v43, %v2845_v17  ;;  %v2846_v5 = vadd.f32 %v5229_v62, %v2807_v38 }
 0x43d   : > { %2909 = vst.msk [vmem:[%s5238_s23 + $0xf0] sm:$0xff] %vm578_vm1, %v2877_v20  ;;  %v2878_v34 = vadd.f32 %v3570_v6, %v2846_v5 }
 0x43f   : > { %2910 = vst.msk [vmem:[%s5238_s23 + $0xf8] sm:$0xff] %vm578_vm1, %v2878_v34 }
 0x440   : > { %3584 = shalt.err (!%p3581_p3)
}
 0x441   : > { %s3585_s17 = scalar_lea.hbm %s5395_s8, 4096  ;;  %s3589_s14 = scalar_lea.hbm %s5452_s5, 8192 }
 0x442   : > { %p3586_p4 = scmp.ne.s32.totalorder %s5395_s8, %s3585_s17  ;;  %p3590_p9 = scmp.lt.u32.totalorder %s5395_s8, %s5452_s5 }
 0x443   : > { %p3591_p10 = scmp.lt.u32.totalorder %s3589_s14, %s3585_s17  ;;  %p3593_p12 = scmp.lt.u32.totalorder %s3585_s17, %s5395_s8 }
 0x444   : > { %p3587_p7 = pnand %p3586_p4, %p3709_p5 }
 0x445   : > { %p3592_p11 = por %p3591_p10, %p3590_p9 }
 0x446   : > { %p3588_p8 = pneg %p3587_p7 }
 0x447   : > { %p3594_p13 = por %p3593_p12, %p3592_p11 }
 0x449   : > { %p3595_p0 = pnand %p3594_p13, %p3588_p8 }
 0x44b   : > { %3598 = shalt.err (!%p3595_p0)
}
 0x44c   : > { %s3639_s23 = smov 128   ;;  %s3640_s25 = smov 8  }
 0x44d   : > { %3263 = dma.vmem_to_hbm [thread:$0]  (%p3709_p5), %s5397_s30, 4096, %s5395_s8, %s5406_s22, %s3639_s23, %s3639_s23, %s3640_s25  }
 0x44e PF: > { %p3269_p1 = scmp.ge.s32.totalorder %s3633_s21, 2  ;;  %s2940_s6 = sand.u32 1, %s3621_s18  }
 0x44f   : > { %s2941_s7 = scalar_lea.sflag [#allocation3], %s2940_s6 }
 0x450   : > { %p3266_p2 = pnand %p3269_p1, %p3713_p6 }
 0x452   : > { %3616 = dma.done.wait (!%p3266_p2), %s2941_s7, 4096  }
 0x453   : > { %3618 = vsyncadd (!%p3266_p2), %s2941_s7, 4294963200  ;;  %p15_p3 = scmp.ge.s32.totalorder %s3696_s24, 4   ;;  %s5482_s18 = smov %s3625_s19 }
 0x454   : > { %s5483_s19 = smov %s3629_s20  ;;  %s5484_s20 = smov %s3707_s27 }
 0x455   : > { %s5485_s21 = smov %s3696_s24  ;;  %17 = sbr.rel (!%p15_p3) target bundleno = 3 (0x3), region = 79 }
 0x45c   :  { %2946 = vsyncpa [#allocation3], 1 }
 0x45d   :  { %2948 = vsyncpa [#allocation3 + $0x1], 1 }

</bundles_post_ra>
